<compile_context>
chip_gen: v5e
topology: v5e:2x2
jax: 0.10.0
libtpu: 0.0.40
codegen_flags: <defaults>
</compile_context>

<pallas_src>
import functools

import jax
import jax.numpy as jnp
from jax.experimental import pallas as pl
from jax.experimental.pallas import tpu as pltpu


LANE = 128
SUBLANE = 8


def _round_up(x, m):
    return ((x + m - 1) // m) * m


def _cdiv(a, b):
    return (a + b - 1) // b


# ------------------------------ Pallas kernel -------------------------------

def _mlp_kernel(x_ref, w1_ref, b1_ref, w2_ref, b2_ref, o_ref):
    # x:  (TILE_B, D)        w1: (D, H) bf16    b1: (1, H) f32
    # w2: (H, C_pad) bf16    b2: (1, C_pad) f32  o: (TILE_B, C_pad) f32
    x = x_ref[...].astype(w1_ref.dtype)                       # VPU cast, tiny
    h = jnp.dot(x, w1_ref[...], preferred_element_type=jnp.float32)
    h = jnp.maximum(h + b1_ref[...], 0.0)                     # bias + ReLU in f32
    y = jnp.dot(h.astype(w2_ref.dtype), w2_ref[...],
                preferred_element_type=jnp.float32) + b2_ref[...]
    o_ref[...] = y


# --------------------------- one-time param prep ----------------------------

def prepare_classifier_params(params, weight_dtype=jnp.bfloat16):
    """Repack torch-layout params ONCE (call outside jax.jit).

    w1 (512, D) -> (D, 512); w2 (n_classes, 512) -> (512, C_pad) with the class
    dim zero-padded to a multiple of 128 lanes (lane-dense output stores).
    Weights are cast to `weight_dtype` (bf16 by default); biases stay f32 and
    the kernel accumulates in f32. Returns (prepped_params, n_classes).
    """
    w1_t, b1 = params["w1"], params["b1"]      # (512, D), (512,)
    w2_t, b2 = params["w2"], params["b2"]      # (n_classes, 512), (n_classes,)
    hidden, _d_in = w1_t.shape
    n_classes = w2_t.shape[0]
    c_pad = _round_up(n_classes, LANE)

    w1 = jnp.asarray(w1_t).T.astype(weight_dtype)                       # (D, H)
    w2 = jnp.zeros((hidden, c_pad), weight_dtype).at[:, :n_classes].set(
        jnp.asarray(w2_t).T.astype(weight_dtype))                       # (H, C_pad)
    b1r = jnp.asarray(b1, jnp.float32).reshape(1, hidden)
    b2r = jnp.zeros((1, c_pad), jnp.float32).at[0, :n_classes].set(
        jnp.asarray(b2, jnp.float32))

    return dict(w1=w1, b1=b1r, w2=w2, b2=b2r), n_classes


def _choose_batch_tiling(b, cap=512):
    """Sublane-aligned batch tiles, <= cap rows, minimal pad waste, and >= 2
    grid steps for moderate/large batches (keeps both v7x TensorCores busy)."""
    b8 = _round_up(b, SUBLANE)
    min_tiles = 2 if b8 >= 8 * SUBLANE else 1
    num_tiles = max(min_tiles, _cdiv(b8, cap))
    tile_b = _round_up(_cdiv(b8, num_tiles), SUBLANE)
    num_tiles = _cdiv(b8, tile_b)
    return tile_b, num_tiles


# ------------------------------ jitted forward -------------------------------

@functools.partial(jax.jit, static_argnames=("n_classes",))
def classifier_fcs_forward(x, prepped, *, n_classes):
    """Forward of Classifier_FCs using the pre-packed params."""
    w1, b1 = prepped["w1"], prepped["b1"]      # (D, H), (1, H)
    w2, b2 = prepped["w2"], prepped["b2"]      # (H, C_pad), (1, C_pad)
    d_in, hidden = w1.shape
    c_pad = w2.shape[1]

    # torch: logits = x.view(-1, input_dimension * n_channels)
    x2 = x.reshape(-1, d_in)
    b = x2.shape[0]

    tile_b, num_tiles = _choose_batch_tiling(b)
    b_pad = tile_b * num_tiles
    if b_pad != b:
        x2 = jnp.pad(x2, ((0, b_pad - b), (0, 0)))

    cost = pl.CostEstimate(
        flops=2 * b_pad * (d_in * hidden + hidden * c_pad),
        transcendentals=0,
        bytes_accessed=(b_pad * d_in * x2.dtype.itemsize
                        + w1.size * w1.dtype.itemsize
                        + w2.size * w2.dtype.itemsize
                        + (b1.size + b2.size) * 4
                        + b_pad * c_pad * 4),
    )

    out = pl.pallas_call(
        _mlp_kernel,
        out_shape=jax.ShapeDtypeStruct((b_pad, c_pad), jnp.float32),
        grid=(num_tiles,),
        in_specs=[
            pl.BlockSpec((tile_b, d_in), lambda i: (i, 0)),
            pl.BlockSpec((d_in, hidden), lambda i: (0, 0)),   # VMEM-resident weights
            pl.BlockSpec((1, hidden), lambda i: (0, 0)),
            pl.BlockSpec((hidden, c_pad), lambda i: (0, 0)),
            pl.BlockSpec((1, c_pad), lambda i: (0, 0)),
        ],
        out_specs=pl.BlockSpec((tile_b, c_pad), lambda i: (i, 0)),
        compiler_params=pltpu.CompilerParams(
            dimension_semantics=("parallel",)),
        cost_estimate=cost,
    )(x2, w1, b1, w2, b2)

    return out[:b, :n_classes]


# --------------------------------- driver ------------------------------------

if __name__ == "__main__":
    key = jax.random.PRNGKey(0)
    kx, k1, k2, k3, k4 = jax.random.split(key, 5)

    # Small shapes consistent with the module:
    #   n_channels=4, input_dimension=16*16=256, n_classes=10  =>  D = 1024.
    B, C, Hs, Ws = 2, 4, 16, 16
    n_channels = C
    input_dimension = Hs * Ws
    n_classes = 10
    D = input_dimension * n_channels
    HIDDEN = 512

    x = jax.random.normal(kx, (B, C, Hs, Ws), dtype=jnp.float32)
    params = dict(
        w1=0.05 * jax.random.normal(k1, (HIDDEN, D), dtype=jnp.float32),
        b1=0.05 * jax.random.normal(k2, (HIDDEN,), dtype=jnp.float32),
        w2=0.05 * jax.random.normal(k3, (n_classes, HIDDEN), dtype=jnp.float32),
        b2=0.05 * jax.random.normal(k4, (n_classes,), dtype=jnp.float32),
    )

    # One-time repack outside jit: GEMM layout, 128-lane class pad, bf16 weights.
    prepped, ncls = prepare_classifier_params(params, weight_dtype=jnp.bfloat16)

    out = jax.block_until_ready(
        classifier_fcs_forward(x, prepped, n_classes=ncls))

    # Pure-JAX f32 reference of the torch forward.
    x2 = x.reshape(-1, D)
    ref = (jnp.maximum(x2 @ params["w1"].T + params["b1"], 0.0)
           @ params["w2"].T + params["b2"])

    assert out.shape == (B, n_classes), out.shape
    assert bool(jnp.all(jnp.isfinite(out)))
    # bf16 weights => relaxed tolerance vs the f32 reference (per review note).
    assert bool(jnp.allclose(out, ref, atol=5e-2, rtol=5e-2)), (
        float(jnp.max(jnp.abs(out - ref))))
    print("KERNEL_OK")
</pallas_src>

<mosaic_0001>
module attributes {stable_mosaic.version = 11 : i64} {
  func.func @_mlp_kernel(%arg0: i32, %arg1: memref<8x1024xf32, #tpu.memory_space<vmem>>, %arg2: memref<1024x512xbf16, #tpu.memory_space<vmem>>, %arg3: memref<1x512xf32, #tpu.memory_space<vmem>>, %arg4: memref<512x128xbf16, #tpu.memory_space<vmem>>, %arg5: memref<1x128xf32, #tpu.memory_space<vmem>>, %arg6: memref<8x128xf32, #tpu.memory_space<vmem>>) attributes {dimension_semantics = [#tpu.dimension_semantics<parallel>], iteration_bounds = array<i64: 1>, scalar_prefetch = 0 : i64, scratch_operands = 0 : i64, tpu.core_type = #tpu.core_type<tc>, window_params = [{transform_indices = @transform_0, window_bounds = array<i64: 8, 1024>}, {pipeline_mode = #tpu.pipeline_mode<synchronous>, transform_indices = @transform_1, window_bounds = array<i64: 1024, 512>}, {pipeline_mode = #tpu.pipeline_mode<synchronous>, transform_indices = @transform_2, window_bounds = array<i64: 1, 512>}, {pipeline_mode = #tpu.pipeline_mode<synchronous>, transform_indices = @transform_3, window_bounds = array<i64: 512, 128>}, {pipeline_mode = #tpu.pipeline_mode<synchronous>, transform_indices = @transform_4, window_bounds = array<i64: 1, 128>}, {transform_indices = @transform_5, window_bounds = array<i64: 8, 128>}]} {
    %c0 = arith.constant 0 : index
    %c0_0 = arith.constant 0 : index
    %0 = vector.load %arg1[%c0, %c0_0] : memref<8x1024xf32, #tpu.memory_space<vmem>>, vector<8x1024xf32>
    %1 = arith.truncf %0 : vector<8x1024xf32> to vector<8x1024xbf16>
    %c0_1 = arith.constant 0 : index
    %c0_2 = arith.constant 0 : index
    %2 = vector.load %arg2[%c0_1, %c0_2] : memref<1024x512xbf16, #tpu.memory_space<vmem>>, vector<1024x512xbf16>
    %cst = arith.constant dense<0.000000e+00> : vector<8x512xf32>
    %3 = tpu.matmul %1, %2, %cst {dimension_numbers = #tpu.dot_dimension_numbers<[1], [0], [0], [1], [0, 0, 1, 1], [], []>} : vector<8x1024xbf16>, vector<1024x512xbf16>, vector<8x512xf32> -> vector<8x512xf32>
    %c0_3 = arith.constant 0 : index
    %c0_4 = arith.constant 0 : index
    %4 = vector.load %arg3[%c0_3, %c0_4] : memref<1x512xf32, #tpu.memory_space<vmem>>, vector<1x512xf32>
    %5 = vector.broadcast %4 : vector<1x512xf32> to vector<8x512xf32>
    %6 = arith.addf %3, %5 : vector<8x512xf32>
    %cst_5 = arith.constant 0.000000e+00 : f32
    %7 = vector.broadcast %cst_5 : f32 to vector<8x512xf32>
    %8 = arith.maximumf %6, %7 : vector<8x512xf32>
    %9 = arith.truncf %8 : vector<8x512xf32> to vector<8x512xbf16>
    %c0_6 = arith.constant 0 : index
    %c0_7 = arith.constant 0 : index
    %10 = vector.load %arg4[%c0_6, %c0_7] : memref<512x128xbf16, #tpu.memory_space<vmem>>, vector<512x128xbf16>
    %cst_8 = arith.constant dense<0.000000e+00> : vector<8x128xf32>
    %11 = tpu.matmul %9, %10, %cst_8 {dimension_numbers = #tpu.dot_dimension_numbers<[1], [0], [0], [1], [0, 0, 1, 1], [], []>} : vector<8x512xbf16>, vector<512x128xbf16>, vector<8x128xf32> -> vector<8x128xf32>
    %c0_9 = arith.constant 0 : index
    %c0_10 = arith.constant 0 : index
    %12 = vector.load %arg5[%c0_9, %c0_10] : memref<1x128xf32, #tpu.memory_space<vmem>>, vector<1x128xf32>
    %13 = vector.broadcast %12 : vector<1x128xf32> to vector<8x128xf32>
    %14 = arith.addf %11, %13 : vector<8x128xf32>
    %c0_11 = arith.constant 0 : index
    %c0_12 = arith.constant 0 : index
    %15 = vector.load %arg6[%c0_11, %c0_12] : memref<8x128xf32, #tpu.memory_space<vmem>>, vector<8x128xf32>
    tpu.vector_store %arg6[%c0_11, %c0_12], %14 {strides = array<i32>} : memref<8x128xf32, #tpu.memory_space<vmem>>, vector<8x128xf32>,
    return
  }
  func.func @transform_0(%arg0: i32) -> (i32, i32) {
    %c0_i32 = arith.constant 0 : i32
    %c0_i32_0 = arith.constant 0 : i32
    return %arg0, %c0_i32 : i32, i32
  }
  func.func @transform_1(%arg0: i32) -> (i32, i32) {
    %c0_i32 = arith.constant 0 : i32
    %c0_i32_0 = arith.constant 0 : i32
    %c0_i32_1 = arith.constant 0 : i32
    return %c0_i32, %c0_i32_0 : i32, i32
  }
  func.func @transform_2(%arg0: i32) -> (i32, i32) {
    %c0_i32 = arith.constant 0 : i32
    %c0_i32_0 = arith.constant 0 : i32
    %c0_i32_1 = arith.constant 0 : i32
    return %c0_i32, %c0_i32_0 : i32, i32
  }
  func.func @transform_3(%arg0: i32) -> (i32, i32) {
    %c0_i32 = arith.constant 0 : i32
    %c0_i32_0 = arith.constant 0 : i32
    %c0_i32_1 = arith.constant 0 : i32
    return %c0_i32, %c0_i32_0 : i32, i32
  }
  func.func @transform_4(%arg0: i32) -> (i32, i32) {
    %c0_i32 = arith.constant 0 : i32
    %c0_i32_0 = arith.constant 0 : i32
    %c0_i32_1 = arith.constant 0 : i32
    return %c0_i32, %c0_i32_0 : i32, i32
  }
  func.func @transform_5(%arg0: i32) -> (i32, i32) {
    %c0_i32 = arith.constant 0 : i32
    %c0_i32_0 = arith.constant 0 : i32
    return %arg0, %c0_i32 : i32, i32
  }
}

</mosaic_0001>

<bundles_post_ra>
// kernel: classifier_fcs_forward.1
= control target key start
LH: loop header
LB: loop body
LE: loop exit
PB: predicated region body
PF: predicated region fallthrough
CT: control target
= control target key end

     0   :  { %10 = vsyncpa [#allocation3], 0  ;;  %s4003_s0 = inlined_call_operand.vmem [shape: f32[8,1024], index: 0, kind: input, shape index: {}]   ;;  %s4004_s1 = inlined_call_operand.hbm [shape: bf16[1024,512], index: 1, kind: input, shape index: {}]   ;;  %s4005_s2 = inlined_call_operand.vmem [shape: f32[1,512], index: 2, kind: input, shape index: {}]   ;;  %s4006_s3 = inlined_call_operand.hbm [shape: bf16[512,128], index: 3, kind: input, shape index: {}]   ;;  %s4007_s4 = inlined_call_operand.vmem [shape: f32[1,128], index: 4, kind: input, shape index: {}]   ;;  %s4008_s5 = inlined_call_operand.vmem [shape: f32[8,128], index: 5, kind: output, shape index: {}]  }
   0x1   :  { %s18_s20 = sshll.u32 %s4004_s1, 4  ;;  %s19_s20 = int_to_ptr.hbm [resolvable:$true] %s18_s20 }
   0x2   :  { %11 = vsyncpa [#allocation5], 0  ;;  %s3856_s21 = smov [#allocation2]   ;;  %s33_s25 = sshll.u32 %s4006_s3, 4  ;;  %s34_s25 = int_to_ptr.hbm [resolvable:$true] %s33_s25 }
   0x3   :  { %s20_s22 = sshll.u32 %s3856_s21, 4  ;;  %s3857_s26 = smov 256   ;;  %s21_s22 = int_to_ptr.vmem [resolvable:$true] %s20_s22 }
   0x4   :  { %s3858_s27 = smov 16   ;;  %s3859_s28 = smov [#allocation4]  }
   0x5   :  { %26 = dma.hbm_to_vmem [thread:$0]  %s19_s20, 32768, %s21_s22, [#allocation3], %s3857_s26, %s3857_s26, %s3858_s27  }
   0x6   :  { %s35_s29 = sshll.u32 %s3859_s28, 4  ;;  %s3860_s30 = smov 64   ;;  %s36_s29 = int_to_ptr.vmem [resolvable:$true] %s35_s29 }
   0x7   :  { %s3861_s6 = smov 4  }
   0x8   :  { %41 = dma.hbm_to_vmem [thread:$0]  %s34_s25, 4096, %s36_s29, [#allocation5], %s3860_s30, %s3860_s30, %s3861_s6  }
   0x9   :  { %3852 = dma.done.wait [#allocation3], 32768  }
   0xa   :  { %3853 = vsyncadd [#allocation3], 4294934528 }
   0xb   :  { %3854 = dma.done.wait [#allocation5], 4096  }
   0xc   :  { %3855 = vsyncadd [#allocation5], 4294963200  ;;  %v2471_v0 = vld [vmem:[#allocation2 + $0xe0] sm:$0xf]  ;;  %v3539_v1 = vld [vmem:[#allocation2 + $0xec] sm:$0xf0] }
   0xd   :  { %v2599_v2 = vld [vmem:[#allocation2 + $0x1e0] sm:$0xf]  ;;  %v2472_v3 = vor.u32 %v3539_v1, %v2471_v0  ;;  %v3571_v4 = vld [vmem:[#allocation2 + $0x1ec] sm:$0xf0] }
   0xe   :  { %v2727_v5 = vld [vmem:[#allocation2 + $0x2e0] sm:$0xf]  ;;  %v3603_v6 = vld [vmem:[#allocation2 + $0x2ec] sm:$0xf0]  ;;  %v2600_v7 = vor.u32 %v3571_v4, %v2599_v2 }
   0xf   :  { %v2728_v8 = vor.u32 %v3603_v6, %v2727_v5  ;;  %v2855_v9 = vld [vmem:[#allocation2 + $0x3e0] sm:$0xf]  ;;  %v3635_v10 = vld [vmem:[#allocation2 + $0x3ec] sm:$0xf0]  ;;  %1614 = vmatpush.bf16.msra.mxu0 %v2472_v3 }
  0x10   :  { %v2455_v11 = vld [vmem:[#allocation2 + $0xc0] sm:$0xf]  ;;  %v2856_v12 = vor.u32 %v3635_v10, %v2855_v9  ;;  %v3535_v13 = vld [vmem:[#allocation2 + $0xcc] sm:$0xf0]  ;;  %1627 = vmatpush.bf16.msra.mxu1 %v2600_v7 }
  0x11   :  { %v2583_v14 = vld [vmem:[#allocation2 + $0x1c0] sm:$0xf]  ;;  %v3567_v15 = vld [vmem:[#allocation2 + $0x1cc] sm:$0xf0]  ;;  %1640 = vmatpush.bf16.msra.mxu2 %v2728_v8  ;;  %v2456_v16 = vor.u32 %v3535_v13, %v2455_v11 }
  0x12   :  { %v2584_v17 = vor.u32 %v3567_v15, %v2583_v14  ;;  %v2711_v18 = vld [vmem:[#allocation2 + $0x2c0] sm:$0xf]  ;;  %v3599_v19 = vld [vmem:[#allocation2 + $0x2cc] sm:$0xf0]  ;;  %1653 = vmatpush.bf16.msra.mxu3 %v2856_v12 }
  0x13   :  { %v2839_v20 = vld [vmem:[#allocation2 + $0x3c0] sm:$0xf]  ;;  %v2712_v21 = vor.u32 %v3599_v19, %v2711_v18  ;;  %v3631_v22 = vld [vmem:[#allocation2 + $0x3cc] sm:$0xf0]  ;;  %1615 = vmatpush.bf16.msra.mxu0 %v2456_v16 }
  0x14   :  { %v2439_v23 = vld [vmem:[#allocation2 + $0xa0] sm:$0xf]  ;;  %v3531_v24 = vld [vmem:[#allocation2 + $0xac] sm:$0xf0]  ;;  %v2840_v25 = vor.u32 %v3631_v22, %v2839_v20  ;;  %1628 = vmatpush.bf16.msra.mxu1 %v2584_v17 }
  0x15   :  { %v2567_v26 = vld [vmem:[#allocation2 + $0x1a0] sm:$0xf]  ;;  %v3563_v27 = vld [vmem:[#allocation2 + $0x1ac] sm:$0xf0]  ;;  %v2440_v29 = vor.u32 %v3531_v24, %v2439_v23  ;;  %1641 = vmatpush.bf16.msra.mxu2 %v2712_v21 }
  0x16   :  { %v2695_v28 = vld [vmem:[#allocation2 + $0x2a0] sm:$0xf]  ;;  %v3595_v30 = vld [vmem:[#allocation2 + $0x2ac] sm:$0xf0]  ;;  %v2568_v33 = vor.u32 %v3563_v27, %v2567_v26  ;;  %1654 = vmatpush.bf16.msra.mxu3 %v2840_v25 }
  0x17   :  { %v2823_v31 = vld [vmem:[#allocation2 + $0x3a0] sm:$0xf]  ;;  %v3627_v32 = vld [vmem:[#allocation2 + $0x3ac] sm:$0xf0]  ;;  %v2696_v34 = vor.u32 %v3595_v30, %v2695_v28  ;;  %1616 = vmatpush.bf16.msra.mxu0 %v2440_v29 }
  0x18   :  { %v2423_v35 = vld [vmem:[#allocation2 + $0x80] sm:$0xf]  ;;  %v3527_v36 = vld [vmem:[#allocation2 + $0x8c] sm:$0xf0]  ;;  %v2824_v38 = vor.u32 %v3627_v32, %v2823_v31  ;;  %1629 = vmatpush.bf16.msra.mxu1 %v2568_v33 }
  0x19   :  { %v2551_v37 = vld [vmem:[#allocation2 + $0x180] sm:$0xf]  ;;  %v3559_v39 = vld [vmem:[#allocation2 + $0x18c] sm:$0xf0]  ;;  %v2424_v44 = vor.u32 %v3527_v36, %v2423_v35  ;;  %1642 = vmatpush.bf16.msra.mxu2 %v2696_v34 }
  0x1a   :  { %v2679_v40 = vld [vmem:[#allocation2 + $0x280] sm:$0xf]  ;;  %v3591_v41 = vld [vmem:[#allocation2 + $0x28c] sm:$0xf0]  ;;  %v2552_v45 = vor.u32 %v3559_v39, %v2551_v37  ;;  %1655 = vmatpush.bf16.msra.mxu3 %v2824_v38 }
  0x1b   :  { %v2807_v42 = vld [vmem:[#allocation2 + $0x380] sm:$0xf]  ;;  %v3623_v43 = vld [vmem:[#allocation2 + $0x38c] sm:$0xf0]  ;;  %v2680_v46 = vor.u32 %v3591_v41, %v2679_v40  ;;  %1617 = vmatpush.bf16.msra.mxu0 %v2424_v44 }
  0x1c   :  { %v2407_v47 = vld [vmem:[#allocation2 + $0x60] sm:$0xf]  ;;  %v3523_v48 = vld [vmem:[#allocation2 + $0x6c] sm:$0xf0]  ;;  %v2808_v50 = vor.u32 %v3623_v43, %v2807_v42  ;;  %1630 = vmatpush.bf16.msra.mxu1 %v2552_v45 }
  0x1d   :  { %v2535_v49 = vld [vmem:[#allocation2 + $0x160] sm:$0xf]  ;;  %v3555_v51 = vld [vmem:[#allocation2 + $0x16c] sm:$0xf0]  ;;  %v2408_v56 = vor.u32 %v3523_v48, %v2407_v47  ;;  %1643 = vmatpush.bf16.msra.mxu2 %v2680_v46 }
  0x1e   :  { %v2663_v52 = vld [vmem:[#allocation2 + $0x260] sm:$0xf]  ;;  %v3587_v53 = vld [vmem:[#allocation2 + $0x26c] sm:$0xf0]  ;;  %v2536_v57 = vor.u32 %v3555_v51, %v2535_v49  ;;  %1656 = vmatpush.bf16.msra.mxu3 %v2808_v50 }
  0x1f   :  { %v2791_v54 = vld [vmem:[#allocation2 + $0x360] sm:$0xf]  ;;  %v3619_v55 = vld [vmem:[#allocation2 + $0x36c] sm:$0xf0]  ;;  %v2664_v58 = vor.u32 %v3587_v53, %v2663_v52  ;;  %1618 = vmatpush.bf16.msra.mxu0 %v2408_v56 }
  0x20   :  { %v2391_v59 = vld [vmem:[#allocation2 + $0x40] sm:$0xf]  ;;  %v3519_v60 = vld [vmem:[#allocation2 + $0x4c] sm:$0xf0]  ;;  %v2792_v62 = vor.u32 %v3619_v55, %v2791_v54  ;;  %1631 = vmatpush.bf16.msra.mxu1 %v2536_v57 }
  0x21   :  { %v2519_v61 = vld [vmem:[#allocation2 + $0x140] sm:$0xf]  ;;  %v3551_v63 = vld [vmem:[#allocation2 + $0x14c] sm:$0xf0]  ;;  %v2392_v4 = vor.u32 %v3519_v60, %v2391_v59  ;;  %1644 = vmatpush.bf16.msra.mxu2 %v2664_v58 }
  0x22   :  { %v2647_v0 = vld [vmem:[#allocation2 + $0x240] sm:$0xf]  ;;  %v3583_v1 = vld [vmem:[#allocation2 + $0x24c] sm:$0xf0]  ;;  %v2520_v5 = vor.u32 %v3551_v63, %v2519_v61  ;;  %1657 = vmatpush.bf16.msra.mxu3 %v2792_v62 }
  0x23   :  { %v2775_v2 = vld [vmem:[#allocation2 + $0x340] sm:$0xf]  ;;  %v3615_v3 = vld [vmem:[#allocation2 + $0x34c] sm:$0xf0]  ;;  %v2648_v6 = vor.u32 %v3583_v1, %v2647_v0  ;;  %1619 = vmatpush.bf16.msra.mxu0 %v2392_v4 }
  0x24   :  { %v2375_v7 = vld [vmem:[#allocation2 + $0x20] sm:$0xf]  ;;  %v3515_v8 = vld [vmem:[#allocation2 + $0x2c] sm:$0xf0]  ;;  %v2776_v10 = vor.u32 %v3615_v3, %v2775_v2  ;;  %1632 = vmatpush.bf16.msra.mxu1 %v2520_v5 }
  0x25   :  { %v2503_v9 = vld [vmem:[#allocation2 + $0x120] sm:$0xf]  ;;  %v3547_v11 = vld [vmem:[#allocation2 + $0x12c] sm:$0xf0]  ;;  %v2376_v16 = vor.u32 %v3515_v8, %v2375_v7  ;;  %1645 = vmatpush.bf16.msra.mxu2 %v2648_v6 }
  0x26   :  { %v2631_v12 = vld [vmem:[#allocation2 + $0x220] sm:$0xf]  ;;  %v3579_v13 = vld [vmem:[#allocation2 + $0x22c] sm:$0xf0]  ;;  %v2504_v19 = vor.u32 %v3547_v11, %v2503_v9  ;;  %1658 = vmatpush.bf16.msra.mxu3 %v2776_v10  ;;  %v55_v10 = vld [vmem:[%s4003_s0 + $0x18] sm:$0xff] }
  0x27   :  { %v2759_v14 = vld [vmem:[#allocation2 + $0x320] sm:$0xf]  ;;  %v3611_v15 = vld [vmem:[#allocation2 + $0x32c] sm:$0xf0]  ;;  %v2632_v20 = vor.u32 %v3579_v13, %v2631_v12  ;;  %1620 = vmatpush.bf16.msra.mxu0 %v2376_v16 }
  0x28   :  { %v2359_v17 = vld [vmem:[#allocation2] sm:$0xf]  ;;  %v3511_v18 = vld [vmem:[#allocation2 + $0xc] sm:$0xf0]  ;;  %v2760_v24 = vor.u32 %v3611_v15, %v2759_v14  ;;  %1633 = vmatpush.bf16.msra.mxu1 %v2504_v19  ;;  %v3911_v15 = vpack.c.bf16 %v55_v10, %v55_v10  ;;  %v53_v19 = vld [vmem:[%s4003_s0 + $0x8] sm:$0xff] }
  0x29   :  { %v2487_v21 = vld [vmem:[#allocation2 + $0x100] sm:$0xf]  ;;  %v3543_v22 = vld [vmem:[#allocation2 + $0x10c] sm:$0xf0]  ;;  %v2360_v31 = vor.u32 %v3511_v18, %v2359_v17  ;;  %1646 = vmatpush.bf16.msra.mxu2 %v2632_v20  ;;  %v2601_v10 = vld [vmem:[#allocation2 + $0x1f0] sm:$0xf0] }
  0x2a   :  { %v2615_v23 = vld [vmem:[#allocation2 + $0x200] sm:$0xf]  ;;  %v3575_v25 = vld [vmem:[#allocation2 + $0x20c] sm:$0xf0]  ;;  %v2488_v35 = vor.u32 %v3543_v22, %v2487_v21  ;;  %1659 = vmatpush.bf16.msra.mxu3 %v2760_v24 }
  0x2b   :  { %v2743_v26 = vld [vmem:[#allocation2 + $0x300] sm:$0xf]  ;;  %v3607_v27 = vld [vmem:[#allocation2 + $0x30c] sm:$0xf0]  ;;  %v2616_v36 = vor.u32 %v3575_v25, %v2615_v23  ;;  %1621 = vmatpush.bf16.msra.mxu0 %v2360_v31  ;;  %v3919_v25 = vpack.c.bf16 %v53_v19, %v53_v19 }
  0x2c   :  { %v2983_v28 = vld [vmem:[#allocation2 + $0x4e0] sm:$0xf]  ;;  %v3667_v29 = vld [vmem:[#allocation2 + $0x4ec] sm:$0xf0]  ;;  %v2744_v39 = vor.u32 %v3607_v27, %v2743_v26  ;;  %1634 = vmatpush.bf16.msra.mxu1 %v2488_v35 }
  0x2d   :  { %v3111_v30 = vld [vmem:[#allocation2 + $0x5e0] sm:$0xf]  ;;  %v3699_v32 = vld [vmem:[#allocation2 + $0x5ec] sm:$0xf0]  ;;  %v2984_v40 = vor.u32 %v3667_v29, %v2983_v28  ;;  %1647 = vmatpush.bf16.msra.mxu2 %v2616_v36 }
  0x2e   :  { %v3239_v33 = vld [vmem:[#allocation2 + $0x6e0] sm:$0xf]  ;;  %v3731_v34 = vld [vmem:[#allocation2 + $0x6ec] sm:$0xf0]  ;;  %v3112_v41 = vor.u32 %v3699_v32, %v3111_v30  ;;  %1660 = vmatpush.bf16.msra.mxu3 %v2744_v39 }
  0x2f   :  { %v3367_v37 = vld [vmem:[#allocation2 + $0x7e0] sm:$0xf]  ;;  %v3763_v38 = vld [vmem:[#allocation2 + $0x7ec] sm:$0xf0]  ;;  %v3240_v42 = vor.u32 %v3731_v34, %v3239_v33  ;;  %1666 = vmatpush.bf16.msrb.mxu0 %v2984_v40  ;;  %1635 = vmatmul.bf16.vlgmr.msra.gmra.mxu1 %v3919_v25 }
  0x30   :  { %v2967_v43 = vld [vmem:[#allocation2 + $0x4c0] sm:$0xf]  ;;  %v3663_v44 = vld [vmem:[#allocation2 + $0x4cc] sm:$0xf0]  ;;  %v3368_v46 = vor.u32 %v3763_v38, %v3367_v37  ;;  %1679 = vmatpush.bf16.msrb.mxu1 %v3112_v41 }
  0x31   :  { %v3095_v45 = vld [vmem:[#allocation2 + $0x5c0] sm:$0xf]  ;;  %v3695_v47 = vld [vmem:[#allocation2 + $0x5cc] sm:$0xf0]  ;;  %v2968_v52 = vor.u32 %v3663_v44, %v2967_v43  ;;  %1692 = vmatpush.bf16.msrb.mxu2 %v3240_v42  ;;  %1661 = vmatmul.bf16.vlgmr.msra.gmra.mxu3 %v3911_v15 }
  0x32   :  { %v3223_v48 = vld [vmem:[#allocation2 + $0x6c0] sm:$0xf]  ;;  %v3727_v49 = vld [vmem:[#allocation2 + $0x6cc] sm:$0xf0]  ;;  %v3096_v54 = vor.u32 %v3695_v47, %v3095_v45  ;;  %1705 = vmatpush.bf16.msrb.mxu3 %v3368_v46 }
  0x33   :  { %v3351_v50 = vld [vmem:[#allocation2 + $0x7c0] sm:$0xf]  ;;  %v3759_v51 = vld [vmem:[#allocation2 + $0x7cc] sm:$0xf0]  ;;  %v3224_v55 = vor.u32 %v3727_v49, %v3223_v48  ;;  %1667 = vmatpush.bf16.msrb.mxu0 %v2968_v52 }
  0x34   :  { %v2951_v53 = vld [vmem:[#allocation2 + $0x4a0] sm:$0xf]  ;;  %v3659_v56 = vld [vmem:[#allocation2 + $0x4ac] sm:$0xf0]  ;;  %v3352_v59 = vor.u32 %v3759_v51, %v3351_v50  ;;  %1680 = vmatpush.bf16.msrb.mxu1 %v3096_v54 }
  0x35   :  { %v3079_v57 = vld [vmem:[#allocation2 + $0x5a0] sm:$0xf]  ;;  %v3691_v58 = vld [vmem:[#allocation2 + $0x5ac] sm:$0xf0]  ;;  %v2952_v0 = vor.u32 %v3659_v56, %v2951_v53  ;;  %1693 = vmatpush.bf16.msrb.mxu2 %v3224_v55 }
  0x36   :  { %v3207_v60 = vld [vmem:[#allocation2 + $0x6a0] sm:$0xf]  ;;  %v3723_v61 = vld [vmem:[#allocation2 + $0x6ac] sm:$0xf0]  ;;  %v3080_v1 = vor.u32 %v3691_v58, %v3079_v57  ;;  %1706 = vmatpush.bf16.msrb.mxu3 %v3352_v59 }
  0x37   :  { %v3335_v62 = vld [vmem:[#allocation2 + $0x7a0] sm:$0xf]  ;;  %v3755_v63 = vld [vmem:[#allocation2 + $0x7ac] sm:$0xf0]  ;;  %v3208_v5 = vor.u32 %v3723_v61, %v3207_v60  ;;  %1668 = vmatpush.bf16.msrb.mxu0 %v2952_v0 }
  0x38   :  { %v2935_v2 = vld [vmem:[#allocation2 + $0x480] sm:$0xf]  ;;  %v54_v3 = vld [vmem:[%s4003_s0 + $0x10] sm:$0xff]  ;;  %v3336_v11 = vor.u32 %v3755_v63, %v3335_v62  ;;  %1681 = vmatpush.bf16.msrb.mxu1 %v3080_v1 }
  0x39   :  { %v52_v4 = vld [vmem:[%s4003_s0] sm:$0xff]  ;;  %v3655_v6 = vld [vmem:[#allocation2 + $0x48c] sm:$0xf0]  ;;  %v3904_v8 = vpack.c.bf16 %v54_v3, %v54_v3  ;;  %1694 = vmatpush.bf16.msrb.mxu2 %v3208_v5  ;;  %v2473_v5 = vld [vmem:[#allocation2 + $0xf0] sm:$0xf0] }
  0x3a   :  { %v3063_v7 = vld [vmem:[#allocation2 + $0x580] sm:$0xf]  ;;  %v3906_v9 = vpack.c.bf16 %v52_v4, %v52_v4  ;;  %v3687_v12 = vld [vmem:[#allocation2 + $0x58c] sm:$0xf0]  ;;  %v2936_v18 = vor.u32 %v3655_v6, %v2935_v2  ;;  %1707 = vmatpush.bf16.msrb.mxu3 %v3336_v11  ;;  %v3537_v4 = vld [vmem:[#allocation2 + $0xe4] sm:$0xf] }
  0x3b   :  { %v3191_v13 = vld [vmem:[#allocation2 + $0x680] sm:$0xf]  ;;  %v3719_v14 = vld [vmem:[#allocation2 + $0x68c] sm:$0xf0]  ;;  %1648 = vmatmul.bf16.vlgmr.msra.gmra.mxu2 %v3904_v8  ;;  %v3064_v20 = vor.u32 %v3687_v12, %v3063_v7  ;;  %v3569_v6 = vld [vmem:[#allocation2 + $0x1e4] sm:$0xf] }
  0x3c   :  { %v3319_v16 = vld [vmem:[#allocation2 + $0x780] sm:$0xf]  ;;  %v3751_v17 = vld [vmem:[#allocation2 + $0x78c] sm:$0xf0]  ;;  %1622 = vmatmul.bf16.vlgmr.msra.gmra.mxu0 %v3906_v9  ;;  %v3192_v21 = vor.u32 %v3719_v14, %v3191_v13  ;;  %v3601_v11 = vld [vmem:[#allocation2 + $0x2e4] sm:$0xf] }
  0x3d   :  { %v2919_v22 = vld [vmem:[#allocation2 + $0x460] sm:$0xf]  ;;  %v3651_v23 = vld [vmem:[#allocation2 + $0x46c] sm:$0xf0]  ;;  %v3320_v26 = vor.u32 %v3751_v17, %v3319_v16  ;;  %1669 = vmatpush.bf16.msrb.mxu0 %v2936_v18  ;;  %1682 = vmatpush.bf16.msrb.mxu1 %v3064_v20  ;;  %v2729_v12 = vld [vmem:[#allocation2 + $0x2f0] sm:$0xf0]  ;;  %v2476_v20 = vor.u32 %v3537_v4, %v2473_v5 }
  0x3e   :  { %v3047_v24 = vld [vmem:[#allocation2 + $0x560] sm:$0xf]  ;;  %v3683_v27 = vld [vmem:[#allocation2 + $0x56c] sm:$0xf0]  ;;  %v2920_v32 = vor.u32 %v3651_v23, %v2919_v22  ;;  %1695 = vmatpush.bf16.msrb.mxu2 %v3192_v21  ;;  %v3633_v16 = vld [vmem:[#allocation2 + $0x3e4] sm:$0xf] }
  0x3f   :  { %v3175_v28 = vld [vmem:[#allocation2 + $0x660] sm:$0xf]  ;;  %v3715_v29 = vld [vmem:[#allocation2 + $0x66c] sm:$0xf0]  ;;  %v3048_v33 = vor.u32 %v3683_v27, %v3047_v24  ;;  %1708 = vmatpush.bf16.msrb.mxu3 %v3320_v26  ;;  %v2857_v17 = vld [vmem:[#allocation2 + $0x3f0] sm:$0xf0]  ;;  %v2604_v24 = vor.u32 %v3569_v6, %v2601_v10  ;;  %v2732_v26 = vor.u32 %v3601_v11, %v2729_v12 }
  0x40   :  { %v3303_v30 = vld [vmem:[#allocation2 + $0x760] sm:$0xf]  ;;  %v3747_v31 = vld [vmem:[#allocation2 + $0x76c] sm:$0xf0]  ;;  %v3176_v34 = vor.u32 %v3715_v29, %v3175_v28  ;;  %v3533_v21 = vld [vmem:[#allocation2 + $0xc4] sm:$0xf] }
  0x41   :  { %v2903_v35 = vld [vmem:[#allocation2 + $0x440] sm:$0xf]  ;;  %v3647_v36 = vld [vmem:[#allocation2 + $0x44c] sm:$0xf0]  ;;  %v3304_v38 = vor.u32 %v3747_v31, %v3303_v30  ;;  %1670 = vmatpush.bf16.msrb.mxu0 %v2920_v32  ;;  %1683 = vmatpush.bf16.msrb.mxu1 %v3048_v33  ;;  %v59_v23 = vld [vmem:[%s4003_s0 + $0x38] sm:$0xff]  ;;  %v2860_v30 = vor.u32 %v3633_v16, %v2857_v17 }
  0x42   :  { %v3031_v37 = vld [vmem:[#allocation2 + $0x540] sm:$0xf]  ;;  %v3679_v39 = vld [vmem:[#allocation2 + $0x54c] sm:$0xf0]  ;;  %v2904_v44 = vor.u32 %v3647_v36, %v2903_v35  ;;  %1696 = vmatpush.bf16.msrb.mxu2 %v3176_v34  ;;  %v2457_v27 = vld [vmem:[#allocation2 + $0xd0] sm:$0xf0] }
  0x43   :  { %v3159_v40 = vld [vmem:[#allocation2 + $0x640] sm:$0xf]  ;;  %v3711_v41 = vld [vmem:[#allocation2 + $0x64c] sm:$0xf0]  ;;  %v3032_v45 = vor.u32 %v3679_v39, %v3031_v37  ;;  %1709 = vmatpush.bf16.msrb.mxu3 %v3304_v38  ;;  %v3565_v28 = vld [vmem:[#allocation2 + $0x1c4] sm:$0xf]  ;;  %v3938_v38 = vpack.c.bf16 %v59_v23, %v59_v23  ;;  %v2460_v39 = vor.u32 %v3533_v21, %v2457_v27 }
  0x44   :  { %v3287_v42 = vld [vmem:[#allocation2 + $0x740] sm:$0xf]  ;;  %v3743_v43 = vld [vmem:[#allocation2 + $0x74c] sm:$0xf0]  ;;  %v3160_v46 = vor.u32 %v3711_v41, %v3159_v40  ;;  %v57_v29 = vld [vmem:[%s4003_s0 + $0x28] sm:$0xff] }
  0x45   :  { %v2887_v47 = vld [vmem:[#allocation2 + $0x420] sm:$0xf]  ;;  %v3643_v48 = vld [vmem:[#allocation2 + $0x42c] sm:$0xf0]  ;;  %v3288_v50 = vor.u32 %v3743_v43, %v3287_v42  ;;  %1671 = vmatpush.bf16.msrb.mxu0 %v2904_v44  ;;  %1684 = vmatpush.bf16.msrb.mxu1 %v3032_v45  ;;  %v2585_v31 = vld [vmem:[#allocation2 + $0x1d0] sm:$0xf0]  ;;  %v3940_v40 = vpack.c.bf16 %v57_v29, %v57_v29 }
  0x46   :  { %v3015_v49 = vld [vmem:[#allocation2 + $0x520] sm:$0xf]  ;;  %v3675_v51 = vld [vmem:[#allocation2 + $0x52c] sm:$0xf0]  ;;  %v2888_v56 = vor.u32 %v3643_v48, %v2887_v47  ;;  %1697 = vmatpush.bf16.msrb.mxu2 %v3160_v46  ;;  %v3597_v32 = vld [vmem:[#allocation2 + $0x2c4] sm:$0xf]  ;;  %v2588_v41 = vor.u32 %v3565_v28, %v2585_v31 }
  0x47   :  { %v3143_v52 = vld [vmem:[#allocation2 + $0x620] sm:$0xf]  ;;  %v3707_v53 = vld [vmem:[#allocation2 + $0x62c] sm:$0xf0]  ;;  %v3016_v59 = vor.u32 %v3675_v51, %v3015_v49  ;;  %1710 = vmatpush.bf16.msrb.mxu3 %v3288_v50  ;;  %v2713_v33 = vld [vmem:[#allocation2 + $0x2d0] sm:$0xf0] }
  0x48   :  { %v3271_v54 = vld [vmem:[#allocation2 + $0x720] sm:$0xf]  ;;  %v3739_v55 = vld [vmem:[#allocation2 + $0x72c] sm:$0xf0]  ;;  %v3144_v60 = vor.u32 %v3707_v53, %v3143_v52  ;;  %v3629_v35 = vld [vmem:[#allocation2 + $0x3c4] sm:$0xf]  ;;  %v2716_v42 = vor.u32 %v3597_v32, %v2713_v33 }
  0x49   :  { %v2871_v57 = vld [vmem:[#allocation2 + $0x400] sm:$0xf]  ;;  %v3639_v58 = vld [vmem:[#allocation2 + $0x40c] sm:$0xf0]  ;;  %v3272_v0 = vor.u32 %v3739_v55, %v3271_v54  ;;  %1672 = vmatpush.bf16.msrb.mxu0 %v2888_v56  ;;  %1685 = vmatpush.bf16.msrb.mxu1 %v3016_v59  ;;  %v2841_v36 = vld [vmem:[#allocation2 + $0x3d0] sm:$0xf0] }
  0x4a   :  { %v2999_v61 = vld [vmem:[#allocation2 + $0x500] sm:$0xf]  ;;  %v3671_v62 = vld [vmem:[#allocation2 + $0x50c] sm:$0xf0]  ;;  %v2872_v7 = vor.u32 %v3639_v58, %v2871_v57  ;;  %1698 = vmatpush.bf16.msrb.mxu2 %v3144_v60  ;;  %v3529_v43 = vld [vmem:[#allocation2 + $0xa4] sm:$0xf]  ;;  %v2844_v46 = vor.u32 %v3629_v35, %v2841_v36 }
  0x4b   :  { %v3127_v63 = vld [vmem:[#allocation2 + $0x600] sm:$0xf]  ;;  %v3703_v1 = vld [vmem:[#allocation2 + $0x60c] sm:$0xf0]  ;;  %v3000_v13 = vor.u32 %v3671_v62, %v2999_v61  ;;  %1711 = vmatpush.bf16.msrb.mxu3 %v3272_v0  ;;  %v2441_v44 = vld [vmem:[#allocation2 + $0xb0] sm:$0xf0] }
  0x4c   :  { %v3255_v2 = vld [vmem:[#allocation2 + $0x700] sm:$0xf]  ;;  %v3735_v3 = vld [vmem:[#allocation2 + $0x70c] sm:$0xf0]  ;;  %v3128_v14 = vor.u32 %v3703_v1, %v3127_v63  ;;  %v3561_v45 = vld [vmem:[#allocation2 + $0x1a4] sm:$0xf]  ;;  %v2444_v52 = vor.u32 %v3529_v43, %v2441_v44 }
  0x4d   :  { %v58_v18 = vld [vmem:[%s4003_s0 + $0x30] sm:$0xff]  ;;  %v3256_v19 = vor.u32 %v3735_v3, %v3255_v2  ;;  %v56_v22 = vld [vmem:[%s4003_s0 + $0x20] sm:$0xff]  ;;  %1673 = vmatpush.bf16.msrb.mxu0 %v2872_v7  ;;  %1686 = vmatpush.bf16.msrb.mxu1 %v3000_v13 }
  0x4e   :  { %v3934_v34 = vpack.c.bf16 %v58_v18, %v58_v18  ;;  %1699 = vmatpush.bf16.msrb.mxu2 %v3128_v14  ;;  %v3936_v37 = vpack.c.bf16 %v56_v22, %v56_v22  ;;  %v2569_v47 = vld [vmem:[#allocation2 + $0x1b0] sm:$0xf0]  ;;  %v3593_v48 = vld [vmem:[#allocation2 + $0x2a4] sm:$0xf] }
  0x4f   :  { %1712 = vmatpush.bf16.msrb.mxu3 %v3256_v19  ;;  %v2697_v49 = vld [vmem:[#allocation2 + $0x2b0] sm:$0xf0]  ;;  %v3625_v50 = vld [vmem:[#allocation2 + $0x3a4] sm:$0xf]  ;;  %v2572_v53 = vor.u32 %v3561_v45, %v2569_v47 }
  0x50   :  { %v2825_v51 = vld [vmem:[#allocation2 + $0x3b0] sm:$0xf0]  ;;  %1674 = vmatmul.bf16.vlgmr.msrb.gmra.mxu0 %v3936_v37  ;;  %1687 = vmatmul.bf16.vlgmr.msrb.gmra.mxu1 %v3940_v40  ;;  %v2700_v54 = vor.u32 %v3593_v48, %v2697_v49  ;;  %v3525_v55 = vld [vmem:[#allocation2 + $0x84] sm:$0xf] }
  0x51   :  { %1718 = vmatpush.bf16.msra.mxu0 %v2476_v20  ;;  %1731 = vmatpush.bf16.msra.mxu1 %v2604_v24  ;;  %v2425_v56 = vld [vmem:[#allocation2 + $0x90] sm:$0xf0]  ;;  %v3557_v57 = vld [vmem:[#allocation2 + $0x184] sm:$0xf]  ;;  %v2828_v58 = vor.u32 %v3625_v50, %v2825_v51 }
  0x52   :  { %1744 = vmatpush.bf16.msra.mxu2 %v2732_v26  ;;  %1713 = vmatmul.bf16.vlgmr.msrb.gmra.mxu3 %v3938_v38  ;;  %v2553_v59 = vld [vmem:[#allocation2 + $0x190] sm:$0xf0]  ;;  %v3589_v60 = vld [vmem:[#allocation2 + $0x284] sm:$0xf]  ;;  %v2428_v0 = vor.u32 %v3525_v55, %v2425_v56 }
  0x53   :  { %1757 = vmatpush.bf16.msra.mxu3 %v2860_v30  ;;  %1700 = vmatmul.bf16.vlgmr.msrb.gmra.mxu2 %v3934_v34  ;;  %v2681_v61 = vld [vmem:[#allocation2 + $0x290] sm:$0xf0]  ;;  %v3621_v62 = vld [vmem:[#allocation2 + $0x384] sm:$0xf]  ;;  %v2556_v1 = vor.u32 %v3557_v57, %v2553_v59 }
  0x54   :  { %v2809_v63 = vld [vmem:[#allocation2 + $0x390] sm:$0xf0]  ;;  %v2684_v2 = vor.u32 %v3589_v60, %v2681_v61  ;;  %v3521_v3 = vld [vmem:[#allocation2 + $0x64] sm:$0xf] }
  0x55   :  { %1719 = vmatpush.bf16.msra.mxu0 %v2460_v39  ;;  %1732 = vmatpush.bf16.msra.mxu1 %v2588_v41  ;;  %v2409_v4 = vld [vmem:[#allocation2 + $0x70] sm:$0xf0]  ;;  %v3553_v5 = vld [vmem:[#allocation2 + $0x164] sm:$0xf]  ;;  %v2812_v6 = vor.u32 %v3621_v62, %v2809_v63 }
  0x56   :  { %1745 = vmatpush.bf16.msra.mxu2 %v2716_v42  ;;  %v2537_v7 = vld [vmem:[#allocation2 + $0x170] sm:$0xf0]  ;;  %v3585_v10 = vld [vmem:[#allocation2 + $0x264] sm:$0xf]  ;;  %v2412_v14 = vor.u32 %v3521_v3, %v2409_v4 }
  0x57   :  { %1758 = vmatpush.bf16.msra.mxu3 %v2844_v46  ;;  %v2665_v11 = vld [vmem:[#allocation2 + $0x270] sm:$0xf0]  ;;  %v3617_v12 = vld [vmem:[#allocation2 + $0x364] sm:$0xf]  ;;  %v2540_v16 = vor.u32 %v3553_v5, %v2537_v7 }
  0x58   :  { %v2793_v13 = vld [vmem:[#allocation2 + $0x370] sm:$0xf0]  ;;  %v2668_v17 = vor.u32 %v3585_v10, %v2665_v11  ;;  %v3517_v18 = vld [vmem:[#allocation2 + $0x44] sm:$0xf] }
  0x59   :  { %1720 = vmatpush.bf16.msra.mxu0 %v2444_v52  ;;  %1733 = vmatpush.bf16.msra.mxu1 %v2572_v53  ;;  %v2393_v19 = vld [vmem:[#allocation2 + $0x50] sm:$0xf0]  ;;  %v3549_v20 = vld [vmem:[#allocation2 + $0x144] sm:$0xf]  ;;  %v2796_v21 = vor.u32 %v3617_v12, %v2793_v13 }
  0x5a   :  { %1746 = vmatpush.bf16.msra.mxu2 %v2700_v54  ;;  %v2521_v22 = vld [vmem:[#allocation2 + $0x150] sm:$0xf0]  ;;  %v3581_v23 = vld [vmem:[#allocation2 + $0x244] sm:$0xf]  ;;  %v2396_v28 = vor.u32 %v3517_v18, %v2393_v19 }
  0x5b   :  { %1759 = vmatpush.bf16.msra.mxu3 %v2828_v58  ;;  %v2649_v24 = vld [vmem:[#allocation2 + $0x250] sm:$0xf0]  ;;  %v3613_v26 = vld [vmem:[#allocation2 + $0x344] sm:$0xf]  ;;  %v2524_v29 = vor.u32 %v3549_v20, %v2521_v22 }
  0x5c   :  { %v2777_v27 = vld [vmem:[#allocation2 + $0x350] sm:$0xf0]  ;;  %v2652_v30 = vor.u32 %v3581_v23, %v2649_v24  ;;  %v3513_v31 = vld [vmem:[#allocation2 + $0x24] sm:$0xf] }
  0x5d   :  { %1721 = vmatpush.bf16.msra.mxu0 %v2428_v0  ;;  %1734 = vmatpush.bf16.msra.mxu1 %v2556_v1  ;;  %v2377_v32 = vld [vmem:[#allocation2 + $0x30] sm:$0xf0]  ;;  %v3545_v33 = vld [vmem:[#allocation2 + $0x124] sm:$0xf]  ;;  %v2780_v35 = vor.u32 %v3613_v26, %v2777_v27 }
  0x5e   :  { %1747 = vmatpush.bf16.msra.mxu2 %v2684_v2  ;;  %v2505_v36 = vld [vmem:[#allocation2 + $0x130] sm:$0xf0]  ;;  %v3577_v39 = vld [vmem:[#allocation2 + $0x224] sm:$0xf]  ;;  %v2380_v44 = vor.u32 %v3513_v31, %v2377_v32 }
  0x5f   :  { %1760 = vmatpush.bf16.msra.mxu3 %v2812_v6  ;;  %v2633_v41 = vld [vmem:[#allocation2 + $0x230] sm:$0xf0]  ;;  %v3609_v42 = vld [vmem:[#allocation2 + $0x324] sm:$0xf]  ;;  %v2508_v47 = vor.u32 %v3545_v33, %v2505_v36 }
  0x60   :  { %v2761_v43 = vld [vmem:[#allocation2 + $0x330] sm:$0xf0]  ;;  %v3509_v45 = vld [vmem:[#allocation2 + $0x4] sm:$0xf]  ;;  %v2636_v48 = vor.u32 %v3577_v39, %v2633_v41 }
  0x61   :  { %1722 = vmatpush.bf16.msra.mxu0 %v2412_v14  ;;  %1735 = vmatpush.bf16.msra.mxu1 %v2540_v16  ;;  %v2361_v46 = vld [vmem:[#allocation2 + $0x10] sm:$0xf0]  ;;  %v3541_v49 = vld [vmem:[#allocation2 + $0x104] sm:$0xf]  ;;  %v2764_v52 = vor.u32 %v3609_v42, %v2761_v43 }
  0x62   :  { %1748 = vmatpush.bf16.msra.mxu2 %v2668_v17  ;;  %v2489_v50 = vld [vmem:[#allocation2 + $0x110] sm:$0xf0]  ;;  %v3573_v51 = vld [vmem:[#allocation2 + $0x204] sm:$0xf]  ;;  %v2364_v59 = vor.u32 %v3509_v45, %v2361_v46 }
  0x63   :  { %1761 = vmatpush.bf16.msra.mxu3 %v2796_v21  ;;  %v2617_v53 = vld [vmem:[#allocation2 + $0x210] sm:$0xf0]  ;;  %v3605_v54 = vld [vmem:[#allocation2 + $0x304] sm:$0xf]  ;;  %v2492_v63 = vor.u32 %v3541_v49, %v2489_v50 }
  0x64   :  { %v2745_v55 = vld [vmem:[#allocation2 + $0x310] sm:$0xf0]  ;;  %v3665_v56 = vld [vmem:[#allocation2 + $0x4e4] sm:$0xf]  ;;  %v2620_v0 = vor.u32 %v3573_v51, %v2617_v53 }
  0x65   :  { %1723 = vmatpush.bf16.msra.mxu0 %v2396_v28  ;;  %1736 = vmatpush.bf16.msra.mxu1 %v2524_v29  ;;  %v2985_v57 = vld [vmem:[#allocation2 + $0x4f0] sm:$0xf0]  ;;  %v3697_v58 = vld [vmem:[#allocation2 + $0x5e4] sm:$0xf]  ;;  %v2748_v3 = vor.u32 %v3605_v54, %v2745_v55 }
  0x66   :  { %1749 = vmatpush.bf16.msra.mxu2 %v2652_v30  ;;  %v3113_v60 = vld [vmem:[#allocation2 + $0x5f0] sm:$0xf0]  ;;  %v3729_v61 = vld [vmem:[#allocation2 + $0x6e4] sm:$0xf]  ;;  %v2988_v4 = vor.u32 %v3665_v56, %v2985_v57 }
  0x67   :  { %1762 = vmatpush.bf16.msra.mxu3 %v2780_v35  ;;  %v3241_v62 = vld [vmem:[#allocation2 + $0x6f0] sm:$0xf0]  ;;  %v3761_v1 = vld [vmem:[#allocation2 + $0x7e4] sm:$0xf]  ;;  %v3116_v5 = vor.u32 %v3697_v58, %v3113_v60 }
  0x68   :  { %v3369_v2 = vld [vmem:[#allocation2 + $0x7f0] sm:$0xf0]  ;;  %v3244_v6 = vor.u32 %v3729_v61, %v3241_v62  ;;  %v3661_v7 = vld [vmem:[#allocation2 + $0x4c4] sm:$0xf] }
  0x69   :  { %1724 = vmatpush.bf16.msra.mxu0 %v2380_v44  ;;  %1737 = vmatpush.bf16.msra.mxu1 %v2508_v47  ;;  %v2969_v10 = vld [vmem:[#allocation2 + $0x4d0] sm:$0xf0]  ;;  %v3693_v11 = vld [vmem:[#allocation2 + $0x5c4] sm:$0xf]  ;;  %v3372_v12 = vor.u32 %v3761_v1, %v3369_v2 }
  0x6a   :  { %1750 = vmatpush.bf16.msra.mxu2 %v2636_v48  ;;  %v3097_v13 = vld [vmem:[#allocation2 + $0x5d0] sm:$0xf0]  ;;  %v3725_v14 = vld [vmem:[#allocation2 + $0x6c4] sm:$0xf]  ;;  %v2972_v19 = vor.u32 %v3661_v7, %v2969_v10 }
  0x6b   :  { %1763 = vmatpush.bf16.msra.mxu3 %v2764_v52  ;;  %v3225_v16 = vld [vmem:[#allocation2 + $0x6d0] sm:$0xf0]  ;;  %v3757_v17 = vld [vmem:[#allocation2 + $0x7c4] sm:$0xf]  ;;  %v3100_v20 = vor.u32 %v3693_v11, %v3097_v13 }
  0x6c   :  { %v3353_v18 = vld [vmem:[#allocation2 + $0x7d0] sm:$0xf0]  ;;  %v3228_v21 = vor.u32 %v3725_v14, %v3225_v16  ;;  %v3657_v22 = vld [vmem:[#allocation2 + $0x4a4] sm:$0xf] }
  0x6d   :  { %1725 = vmatpush.bf16.msra.mxu0 %v2364_v59  ;;  %1738 = vmatpush.bf16.msra.mxu1 %v2492_v63  ;;  %v2953_v23 = vld [vmem:[#allocation2 + $0x4b0] sm:$0xf0]  ;;  %v3689_v24 = vld [vmem:[#allocation2 + $0x5a4] sm:$0xf]  ;;  %v3356_v26 = vor.u32 %v3757_v17, %v3353_v18 }
  0x6e   :  { %1751 = vmatpush.bf16.msra.mxu2 %v2620_v0  ;;  %v3081_v27 = vld [vmem:[#allocation2 + $0x5b0] sm:$0xf0]  ;;  %v3721_v28 = vld [vmem:[#allocation2 + $0x6a4] sm:$0xf]  ;;  %v2956_v32 = vor.u32 %v3657_v22, %v2953_v23 }
  0x6f   :  { %1764 = vmatpush.bf16.msra.mxu3 %v2748_v3  ;;  %v3209_v29 = vld [vmem:[#allocation2 + $0x6b0] sm:$0xf0]  ;;  %v3753_v30 = vld [vmem:[#allocation2 + $0x7a4] sm:$0xf]  ;;  %v3084_v33 = vor.u32 %v3689_v24, %v3081_v27 }
  0x70   :  { %v3337_v31 = vld [vmem:[#allocation2 + $0x7b0] sm:$0xf0]  ;;  %1726 = vmatmul.bf16.vlgmr.msra.gmra.mxu0 %v3906_v9  ;;  %1739 = vmatmul.bf16.vlgmr.msra.gmra.mxu1 %v3919_v25  ;;  %v3212_v35 = vor.u32 %v3721_v28, %v3209_v29  ;;  %v3653_v36 = vld [vmem:[#allocation2 + $0x484] sm:$0xf] }
  0x71   :  { %1770 = vmatpush.bf16.msrb.mxu0 %v2988_v4  ;;  %1783 = vmatpush.bf16.msrb.mxu1 %v3116_v5  ;;  %v2937_v39 = vld [vmem:[#allocation2 + $0x490] sm:$0xf0]  ;;  %v3685_v41 = vld [vmem:[#allocation2 + $0x584] sm:$0xf]  ;;  %v3340_v42 = vor.u32 %v3753_v30, %v3337_v31 }
  0x72   :  { %1796 = vmatpush.bf16.msrb.mxu2 %v3244_v6  ;;  %1765 = vmatmul.bf16.vlgmr.msra.gmra.mxu3 %v3911_v15  ;;  %v3065_v43 = vld [vmem:[#allocation2 + $0x590] sm:$0xf0]  ;;  %v3717_v44 = vld [vmem:[#allocation2 + $0x684] sm:$0xf]  ;;  %v2940_v48 = vor.u32 %v3653_v36, %v2937_v39  ;;  %v2479_v39 = vld [vmem:[#allocation2 + $0xe8] sm:$0xf] }
  0x73   :  { %1809 = vmatpush.bf16.msrb.mxu3 %v3372_v12  ;;  %1752 = vmatmul.bf16.vlgmr.msra.gmra.mxu2 %v3904_v8  ;;  %v3193_v45 = vld [vmem:[#allocation2 + $0x690] sm:$0xf0]  ;;  %v3749_v46 = vld [vmem:[#allocation2 + $0x784] sm:$0xf]  ;;  %v3068_v49 = vor.u32 %v3685_v41, %v3065_v43  ;;  %v3540_v41 = vld [vmem:[#allocation2 + $0xf4] sm:$0xf0] }
  0x74   :  { %v3321_v47 = vld [vmem:[#allocation2 + $0x790] sm:$0xf0]  ;;  %v3196_v50 = vor.u32 %v3717_v44, %v3193_v45  ;;  %v3649_v51 = vld [vmem:[#allocation2 + $0x464] sm:$0xf]  ;;  %v3572_v44 = vld [vmem:[#allocation2 + $0x1f4] sm:$0xf0] }
  0x75   :  { %1771 = vmatpush.bf16.msrb.mxu0 %v2972_v19  ;;  %1784 = vmatpush.bf16.msrb.mxu1 %v3100_v20  ;;  %v2921_v52 = vld [vmem:[#allocation2 + $0x470] sm:$0xf0]  ;;  %v3681_v53 = vld [vmem:[#allocation2 + $0x564] sm:$0xf]  ;;  %v3324_v54 = vor.u32 %v3749_v46, %v3321_v47  ;;  %v2735_v45 = vld [vmem:[#allocation2 + $0x2e8] sm:$0xf] }
  0x76   :  { %1797 = vmatpush.bf16.msrb.mxu2 %v3228_v21  ;;  %v3049_v55 = vld [vmem:[#allocation2 + $0x570] sm:$0xf0]  ;;  %v3713_v56 = vld [vmem:[#allocation2 + $0x664] sm:$0xf]  ;;  %v2924_v60 = vor.u32 %v3649_v51, %v2921_v52  ;;  %v3604_v46 = vld [vmem:[#allocation2 + $0x2f4] sm:$0xf0]  ;;  %v2480_v52 = vor.u32 %v3540_v41, %v2479_v39 }
  0x77   :  { %1810 = vmatpush.bf16.msrb.mxu3 %v3356_v26  ;;  %v3177_v57 = vld [vmem:[#allocation2 + $0x670] sm:$0xf0]  ;;  %v3745_v58 = vld [vmem:[#allocation2 + $0x764] sm:$0xf]  ;;  %v3052_v61 = vor.u32 %v3681_v53, %v3049_v55  ;;  %v2463_v55 = vld [vmem:[#allocation2 + $0xc8] sm:$0xf] }
  0x78   :  { %v3305_v59 = vld [vmem:[#allocation2 + $0x770] sm:$0xf0]  ;;  %v3180_v62 = vor.u32 %v3713_v56, %v3177_v57  ;;  %v3645_v63 = vld [vmem:[#allocation2 + $0x444] sm:$0xf]  ;;  %v3536_v56 = vld [vmem:[#allocation2 + $0xd4] sm:$0xf0] }
  0x79   :  { %1772 = vmatpush.bf16.msrb.mxu0 %v2956_v32  ;;  %1785 = vmatpush.bf16.msrb.mxu1 %v3084_v33  ;;  %v2905_v0 = vld [vmem:[#allocation2 + $0x450] sm:$0xf0]  ;;  %v3677_v1 = vld [vmem:[#allocation2 + $0x544] sm:$0xf]  ;;  %v3308_v2 = vor.u32 %v3745_v58, %v3305_v59  ;;  %v2591_v57 = vld [vmem:[#allocation2 + $0x1c8] sm:$0xf] }
  0x7a   :  { %1798 = vmatpush.bf16.msrb.mxu2 %v3212_v35  ;;  %v3033_v3 = vld [vmem:[#allocation2 + $0x550] sm:$0xf0]  ;;  %v3709_v4 = vld [vmem:[#allocation2 + $0x644] sm:$0xf]  ;;  %v2908_v10 = vor.u32 %v3645_v63, %v2905_v0  ;;  %v3568_v59 = vld [vmem:[#allocation2 + $0x1d4] sm:$0xf0]  ;;  %v2464_v0 = vor.u32 %v3536_v56, %v2463_v55 }
  0x7b   :  { %1811 = vmatpush.bf16.msrb.mxu3 %v3340_v42  ;;  %v3161_v5 = vld [vmem:[#allocation2 + $0x650] sm:$0xf0]  ;;  %v3741_v6 = vld [vmem:[#allocation2 + $0x744] sm:$0xf]  ;;  %v3036_v11 = vor.u32 %v3677_v1, %v3033_v3  ;;  %v2607_v42 = vld [vmem:[#allocation2 + $0x1e8] sm:$0xf]  ;;  %v2592_v1 = vor.u32 %v3568_v59, %v2591_v57 }
  0x7c   :  { %v3289_v7 = vld [vmem:[#allocation2 + $0x750] sm:$0xf0]  ;;  %v3164_v12 = vor.u32 %v3709_v4, %v3161_v5  ;;  %v3641_v13 = vld [vmem:[#allocation2 + $0x424] sm:$0xf]  ;;  %v2608_v53 = vor.u32 %v3572_v44, %v2607_v42  ;;  %v3632_v63 = vld [vmem:[#allocation2 + $0x3d4] sm:$0xf0] }
  0x7d   :  { %1773 = vmatpush.bf16.msrb.mxu0 %v2940_v48  ;;  %1786 = vmatpush.bf16.msrb.mxu1 %v3068_v49  ;;  %v2889_v14 = vld [vmem:[#allocation2 + $0x430] sm:$0xf0]  ;;  %v3673_v16 = vld [vmem:[#allocation2 + $0x524] sm:$0xf]  ;;  %v3292_v17 = vor.u32 %v3741_v6, %v3289_v7  ;;  %v2863_v49 = vld [vmem:[#allocation2 + $0x3e8] sm:$0xf] }
  0x7e   :  { %1799 = vmatpush.bf16.msrb.mxu2 %v3196_v50  ;;  %v3017_v18 = vld [vmem:[#allocation2 + $0x530] sm:$0xf0]  ;;  %v3705_v19 = vld [vmem:[#allocation2 + $0x624] sm:$0xf]  ;;  %v2892_v23 = vor.u32 %v3641_v13, %v2889_v14  ;;  %v3636_v50 = vld [vmem:[#allocation2 + $0x3f4] sm:$0xf0] }
  0x7f   :  { %1812 = vmatpush.bf16.msrb.mxu3 %v3324_v54  ;;  %v3145_v20 = vld [vmem:[#allocation2 + $0x630] sm:$0xf0]  ;;  %v3737_v21 = vld [vmem:[#allocation2 + $0x724] sm:$0xf]  ;;  %v3020_v27 = vor.u32 %v3673_v16, %v3017_v18  ;;  %v2736_v54 = vor.u32 %v3604_v46, %v2735_v45  ;;  %v2864_v58 = vor.u32 %v3636_v50, %v2863_v49  ;;  %v2447_v3 = vld [vmem:[#allocation2 + $0xa8] sm:$0xf] }
  0x80   :  { %v3273_v22 = vld [vmem:[#allocation2 + $0x730] sm:$0xf0]  ;;  %v3637_v24 = vld [vmem:[#allocation2 + $0x404] sm:$0xf]  ;;  %v3148_v28 = vor.u32 %v3705_v19, %v3145_v20  ;;  %v3532_v4 = vld [vmem:[#allocation2 + $0xb4] sm:$0xf0] }
  0x81   :  { %1774 = vmatpush.bf16.msrb.mxu0 %v2924_v60  ;;  %1787 = vmatpush.bf16.msrb.mxu1 %v3052_v61  ;;  %v2873_v26 = vld [vmem:[#allocation2 + $0x410] sm:$0xf0]  ;;  %v3669_v29 = vld [vmem:[#allocation2 + $0x504] sm:$0xf]  ;;  %v3276_v32 = vor.u32 %v3737_v21, %v3273_v22  ;;  %v2719_v60 = vld [vmem:[#allocation2 + $0x2c8] sm:$0xf]  ;;  %v2448_v14 = vor.u32 %v3532_v4, %v2447_v3 }
  0x82   :  { %1800 = vmatpush.bf16.msrb.mxu2 %v3180_v62  ;;  %v3001_v30 = vld [vmem:[#allocation2 + $0x510] sm:$0xf0]  ;;  %v3701_v31 = vld [vmem:[#allocation2 + $0x604] sm:$0xf]  ;;  %v2876_v43 = vor.u32 %v3637_v24, %v2873_v26  ;;  %v3600_v61 = vld [vmem:[#allocation2 + $0x2d4] sm:$0xf0] }
  0x83   :  { %1813 = vmatpush.bf16.msrb.mxu3 %v3308_v2  ;;  %v3129_v33 = vld [vmem:[#allocation2 + $0x610] sm:$0xf0]  ;;  %v3733_v35 = vld [vmem:[#allocation2 + $0x704] sm:$0xf]  ;;  %v3004_v47 = vor.u32 %v3669_v29, %v3001_v30  ;;  %v2847_v62 = vld [vmem:[#allocation2 + $0x3c8] sm:$0xf]  ;;  %v2720_v2 = vor.u32 %v3600_v61, %v2719_v60 }
  0x84   :  { %v3257_v36 = vld [vmem:[#allocation2 + $0x710] sm:$0xf0]  ;;  %v3132_v48 = vor.u32 %v3701_v31, %v3129_v33  ;;  %v2575_v5 = vld [vmem:[#allocation2 + $0x1a8] sm:$0xf]  ;;  %v2848_v6 = vor.u32 %v3632_v63, %v2847_v62  ;;  %v3564_v7 = vld [vmem:[#allocation2 + $0x1b4] sm:$0xf0] }
  0x85   :  { %1775 = vmatpush.bf16.msrb.mxu0 %v2908_v10  ;;  %1788 = vmatpush.bf16.msrb.mxu1 %v3036_v11  ;;  %v3260_v51 = vor.u32 %v3733_v35, %v3257_v36  ;;  %v2703_v10 = vld [vmem:[#allocation2 + $0x2a8] sm:$0xf]  ;;  %v3596_v11 = vld [vmem:[#allocation2 + $0x2b4] sm:$0xf0]  ;;  %v2576_v16 = vor.u32 %v3564_v7, %v2575_v5 }
  0x86   :  { %1801 = vmatpush.bf16.msrb.mxu2 %v3164_v12  ;;  %v2831_v12 = vld [vmem:[#allocation2 + $0x3a8] sm:$0xf]  ;;  %v3628_v13 = vld [vmem:[#allocation2 + $0x3b4] sm:$0xf0] }
  0x87   :  { %1814 = vmatpush.bf16.msrb.mxu3 %v3292_v17  ;;  %v2704_v17 = vor.u32 %v3596_v11, %v2703_v10  ;;  %v2431_v18 = vld [vmem:[#allocation2 + $0x88] sm:$0xf]  ;;  %v3528_v19 = vld [vmem:[#allocation2 + $0x94] sm:$0xf0]  ;;  %v2832_v21 = vor.u32 %v3628_v13, %v2831_v12 }
  0x88   :  { %v2559_v20 = vld [vmem:[#allocation2 + $0x188] sm:$0xf]  ;;  %v3560_v22 = vld [vmem:[#allocation2 + $0x194] sm:$0xf0] }
  0x89   :  { %1776 = vmatpush.bf16.msrb.mxu0 %v2892_v23  ;;  %1789 = vmatpush.bf16.msrb.mxu1 %v3020_v27  ;;  %v2687_v23 = vld [vmem:[#allocation2 + $0x288] sm:$0xf]  ;;  %v3592_v24 = vld [vmem:[#allocation2 + $0x294] sm:$0xf0]  ;;  %v2560_v29 = vor.u32 %v3560_v22, %v2559_v20 }
  0x8a   :  { %1802 = vmatpush.bf16.msrb.mxu2 %v3148_v28  ;;  %v2815_v26 = vld [vmem:[#allocation2 + $0x388] sm:$0xf]  ;;  %v3624_v27 = vld [vmem:[#allocation2 + $0x394] sm:$0xf0]  ;;  %v2432_v28 = vor.u32 %v3528_v19, %v2431_v18  ;;  %v2688_v30 = vor.u32 %v3592_v24, %v2687_v23 }
  0x8b   :  { %1815 = vmatpush.bf16.msrb.mxu3 %v3276_v32  ;;  %v2415_v31 = vld [vmem:[#allocation2 + $0x68] sm:$0xf]  ;;  %v3524_v32 = vld [vmem:[#allocation2 + $0x74] sm:$0xf0]  ;;  %v2816_v35 = vor.u32 %v3624_v27, %v2815_v26 }
  0x8c   :  { %v2543_v33 = vld [vmem:[#allocation2 + $0x168] sm:$0xf]  ;;  %v3556_v36 = vld [vmem:[#allocation2 + $0x174] sm:$0xf0]  ;;  %v2416_v44 = vor.u32 %v3524_v32, %v2415_v31 }
  0x8d   :  { %1777 = vmatpush.bf16.msrb.mxu0 %v2876_v43  ;;  %1790 = vmatpush.bf16.msrb.mxu1 %v3004_v47  ;;  %v2671_v39 = vld [vmem:[#allocation2 + $0x268] sm:$0xf]  ;;  %v3588_v41 = vld [vmem:[#allocation2 + $0x274] sm:$0xf0]  ;;  %v2544_v45 = vor.u32 %v3556_v36, %v2543_v33 }
  0x8e   :  { %1803 = vmatpush.bf16.msrb.mxu2 %v3132_v48  ;;  %v2799_v42 = vld [vmem:[#allocation2 + $0x368] sm:$0xf]  ;;  %v3620_v43 = vld [vmem:[#allocation2 + $0x374] sm:$0xf0]  ;;  %v2672_v46 = vor.u32 %v3588_v41, %v2671_v39 }
  0x8f   :  { %1816 = vmatpush.bf16.msrb.mxu3 %v3260_v51  ;;  %v2399_v47 = vld [vmem:[#allocation2 + $0x48] sm:$0xf]  ;;  %v3520_v48 = vld [vmem:[#allocation2 + $0x54] sm:$0xf0]  ;;  %v2800_v50 = vor.u32 %v3620_v43, %v2799_v42 }
  0x90   :  { %1778 = vmatmul.bf16.vlgmr.msrb.gmra.mxu0 %v3936_v37  ;;  %1791 = vmatmul.bf16.vlgmr.msrb.gmra.mxu1 %v3940_v40  ;;  %v2527_v49 = vld [vmem:[#allocation2 + $0x148] sm:$0xf]  ;;  %v3552_v51 = vld [vmem:[#allocation2 + $0x154] sm:$0xf0]  ;;  %v2400_v56 = vor.u32 %v3520_v48, %v2399_v47 }
  0x91   :  { %1822 = vmatpush.bf16.msra.mxu0 %v2480_v52  ;;  %1835 = vmatpush.bf16.msra.mxu1 %v2608_v53  ;;  %v2655_v52 = vld [vmem:[#allocation2 + $0x248] sm:$0xf]  ;;  %v3584_v53 = vld [vmem:[#allocation2 + $0x254] sm:$0xf0]  ;;  %v2528_v57 = vor.u32 %v3552_v51, %v2527_v49 }
  0x92   :  { %1848 = vmatpush.bf16.msra.mxu2 %v2736_v54  ;;  %1817 = vmatmul.bf16.vlgmr.msrb.gmra.mxu3 %v3938_v38  ;;  %v2783_v54 = vld [vmem:[#allocation2 + $0x348] sm:$0xf]  ;;  %v3616_v55 = vld [vmem:[#allocation2 + $0x354] sm:$0xf0] }
  0x93   :  { %1861 = vmatpush.bf16.msra.mxu3 %v2864_v58  ;;  %1804 = vmatmul.bf16.vlgmr.msrb.gmra.mxu2 %v3934_v34  ;;  %v2656_v58 = vor.u32 %v3584_v53, %v2655_v52  ;;  %v2383_v59 = vld [vmem:[#allocation2 + $0x28] sm:$0xf]  ;;  %v3516_v60 = vld [vmem:[#allocation2 + $0x34] sm:$0xf0]  ;;  %v2784_v62 = vor.u32 %v3616_v55, %v2783_v54 }
  0x94   :  { %v2511_v61 = vld [vmem:[#allocation2 + $0x128] sm:$0xf]  ;;  %v3548_v63 = vld [vmem:[#allocation2 + $0x134] sm:$0xf0]  ;;  %v2384_v4 = vor.u32 %v3516_v60, %v2383_v59 }
  0x95   :  { %1823 = vmatpush.bf16.msra.mxu0 %v2464_v0  ;;  %1836 = vmatpush.bf16.msra.mxu1 %v2592_v1  ;;  %v2639_v0 = vld [vmem:[#allocation2 + $0x228] sm:$0xf]  ;;  %v3580_v1 = vld [vmem:[#allocation2 + $0x234] sm:$0xf0]  ;;  %v2512_v7 = vor.u32 %v3548_v63, %v2511_v61 }
  0x96   :  { %1849 = vmatpush.bf16.msra.mxu2 %v2720_v2  ;;  %v2767_v2 = vld [vmem:[#allocation2 + $0x328] sm:$0xf]  ;;  %v3612_v3 = vld [vmem:[#allocation2 + $0x334] sm:$0xf0]  ;;  %v2640_v10 = vor.u32 %v3580_v1, %v2639_v0 }
  0x97   :  { %1862 = vmatpush.bf16.msra.mxu3 %v2848_v6  ;;  %v2367_v5 = vld [vmem:[#allocation2 + $0x8] sm:$0xf]  ;;  %v3512_v6 = vld [vmem:[#allocation2 + $0x14] sm:$0xf0] }
  0x98   :  { %v2495_v11 = vld [vmem:[#allocation2 + $0x108] sm:$0xf]  ;;  %v3544_v12 = vld [vmem:[#allocation2 + $0x114] sm:$0xf0]  ;;  %v2368_v22 = vor.u32 %v3512_v6, %v2367_v5  ;;  %v3961_v6 = vld [vmem:[%s4005_s2] sm:$0xf] }
  0x99   :  { %1824 = vmatpush.bf16.msra.mxu0 %v2448_v14  ;;  %1837 = vmatpush.bf16.msra.mxu1 %v2576_v16  ;;  %v2623_v13 = vld [vmem:[#allocation2 + $0x208] sm:$0xf]  ;;  %v2768_v14 = vor.u32 %v3612_v3, %v2767_v2  ;;  %v3576_v16 = vld [vmem:[#allocation2 + $0x214] sm:$0xf0]  ;;  %v2496_v27 = vor.u32 %v3544_v12, %v2495_v11 }
  0x9a   :  { %1850 = vmatpush.bf16.msra.mxu2 %v2704_v17  ;;  %v2751_v17 = vld [vmem:[#allocation2 + $0x308] sm:$0xf]  ;;  %v3608_v18 = vld [vmem:[#allocation2 + $0x314] sm:$0xf0] }
  0x9b   :  { %1863 = vmatpush.bf16.msra.mxu3 %v2832_v21  ;;  %v2991_v19 = vld [vmem:[#allocation2 + $0x4e8] sm:$0xf]  ;;  %v3668_v20 = vld [vmem:[#allocation2 + $0x4f4] sm:$0xf0]  ;;  %v2752_v31 = vor.u32 %v3608_v18, %v2751_v17  ;;  %v326_v18 = vperm.slane %v3961_v6, 0 }
  0x9c   :  { %v3119_v21 = vld [vmem:[#allocation2 + $0x5e8] sm:$0xf]  ;;  %v3700_v23 = vld [vmem:[#allocation2 + $0x5f4] sm:$0xf0]  ;;  %v2992_v32 = vor.u32 %v3668_v20, %v2991_v19 }
  0x9d   :  { %1825 = vmatpush.bf16.msra.mxu0 %v2432_v28  ;;  %1838 = vmatpush.bf16.msra.mxu1 %v2560_v29  ;;  %v3247_v24 = vld [vmem:[#allocation2 + $0x6e8] sm:$0xf]  ;;  %v3732_v26 = vld [vmem:[#allocation2 + $0x6f4] sm:$0xf0]  ;;  %v2624_v28 = vor.u32 %v3576_v16, %v2623_v13  ;;  %v3120_v33 = vor.u32 %v3700_v23, %v3119_v21 }
  0x9e   :  { %1851 = vmatpush.bf16.msra.mxu2 %v2688_v30  ;;  %v3375_v29 = vld [vmem:[#allocation2 + $0x7e8] sm:$0xf]  ;;  %v3764_v30 = vld [vmem:[#allocation2 + $0x7f4] sm:$0xf0] }
  0x9f   :  { %1864 = vmatpush.bf16.msra.mxu3 %v2816_v35  ;;  %v3248_v35 = vor.u32 %v3732_v26, %v3247_v24  ;;  %v2975_v36 = vld [vmem:[#allocation2 + $0x4c8] sm:$0xf]  ;;  %v3664_v39 = vld [vmem:[#allocation2 + $0x4d4] sm:$0xf0]  ;;  %v3376_v42 = vor.u32 %v3764_v30, %v3375_v29 }
  0xa0   :  { %v3103_v41 = vld [vmem:[#allocation2 + $0x5c8] sm:$0xf]  ;;  %v3696_v43 = vld [vmem:[#allocation2 + $0x5d4] sm:$0xf0]  ;;  %v2976_v48 = vor.u32 %v3664_v39, %v2975_v36 }
  0xa1   :  { %1826 = vmatpush.bf16.msra.mxu0 %v2416_v44  ;;  %1839 = vmatpush.bf16.msra.mxu1 %v2544_v45  ;;  %v3231_v44 = vld [vmem:[#allocation2 + $0x6c8] sm:$0xf]  ;;  %v3728_v45 = vld [vmem:[#allocation2 + $0x6d4] sm:$0xf0]  ;;  %v3104_v49 = vor.u32 %v3696_v43, %v3103_v41 }
  0xa2   :  { %1852 = vmatpush.bf16.msra.mxu2 %v2672_v46  ;;  %v3359_v46 = vld [vmem:[#allocation2 + $0x7c8] sm:$0xf]  ;;  %v3760_v47 = vld [vmem:[#allocation2 + $0x7d4] sm:$0xf0] }
  0xa3   :  { %1865 = vmatpush.bf16.msra.mxu3 %v2800_v50  ;;  %v3232_v50 = vor.u32 %v3728_v45, %v3231_v44  ;;  %v2959_v51 = vld [vmem:[#allocation2 + $0x4a8] sm:$0xf]  ;;  %v3660_v52 = vld [vmem:[#allocation2 + $0x4b4] sm:$0xf0]  ;;  %v3360_v54 = vor.u32 %v3760_v47, %v3359_v46 }
  0xa4   :  { %v3087_v53 = vld [vmem:[#allocation2 + $0x5a8] sm:$0xf]  ;;  %v3692_v55 = vld [vmem:[#allocation2 + $0x5b4] sm:$0xf0]  ;;  %v2960_v60 = vor.u32 %v3660_v52, %v2959_v51 }
  0xa5   :  { %1827 = vmatpush.bf16.msra.mxu0 %v2400_v56  ;;  %1840 = vmatpush.bf16.msra.mxu1 %v2528_v57  ;;  %v3215_v56 = vld [vmem:[#allocation2 + $0x6a8] sm:$0xf]  ;;  %v3724_v57 = vld [vmem:[#allocation2 + $0x6b4] sm:$0xf0] }
  0xa6   :  { %1853 = vmatpush.bf16.msra.mxu2 %v2656_v58  ;;  %v3343_v58 = vld [vmem:[#allocation2 + $0x7a8] sm:$0xf]  ;;  %v3756_v59 = vld [vmem:[#allocation2 + $0x7b4] sm:$0xf0]  ;;  %v3216_v63 = vor.u32 %v3724_v57, %v3215_v56 }
  0xa7   :  { %1866 = vmatpush.bf16.msra.mxu3 %v2784_v62  ;;  %v2943_v61 = vld [vmem:[#allocation2 + $0x488] sm:$0xf]  ;;  %v3088_v62 = vor.u32 %v3692_v55, %v3087_v53  ;;  %v3656_v0 = vld [vmem:[#allocation2 + $0x494] sm:$0xf0]  ;;  %v3344_v3 = vor.u32 %v3756_v59, %v3343_v58 }
  0xa8   :  { %v3071_v1 = vld [vmem:[#allocation2 + $0x588] sm:$0xf]  ;;  %v3688_v2 = vld [vmem:[#allocation2 + $0x594] sm:$0xf0]  ;;  %v2944_v11 = vor.u32 %v3656_v0, %v2943_v61 }
  0xa9   :  { %1828 = vmatpush.bf16.msra.mxu0 %v2384_v4  ;;  %1841 = vmatpush.bf16.msra.mxu1 %v2512_v7  ;;  %v3199_v4 = vld [vmem:[#allocation2 + $0x688] sm:$0xf]  ;;  %v3720_v5 = vld [vmem:[#allocation2 + $0x694] sm:$0xf0]  ;;  %v3072_v13 = vor.u32 %v3688_v2, %v3071_v1 }
  0xaa   :  { %1854 = vmatpush.bf16.msra.mxu2 %v2640_v10  ;;  %v3327_v7 = vld [vmem:[#allocation2 + $0x788] sm:$0xf]  ;;  %v3752_v10 = vld [vmem:[#allocation2 + $0x794] sm:$0xf0] }
  0xab   :  { %1867 = vmatpush.bf16.msra.mxu3 %v2768_v14  ;;  %v2927_v12 = vld [vmem:[#allocation2 + $0x468] sm:$0xf]  ;;  %v3200_v14 = vor.u32 %v3720_v5, %v3199_v4  ;;  %v3652_v16 = vld [vmem:[#allocation2 + $0x474] sm:$0xf0]  ;;  %v3328_v19 = vor.u32 %v3752_v10, %v3327_v7 }
  0xac   :  { %v3055_v17 = vld [vmem:[#allocation2 + $0x568] sm:$0xf]  ;;  %v3684_v20 = vld [vmem:[#allocation2 + $0x574] sm:$0xf0]  ;;  %v2928_v26 = vor.u32 %v3652_v16, %v2927_v12  ;;  %v1636_v45 = vpop.f32.mrf.mxu1  ;;  %v2481_v16 = vld [vmem:[#allocation2 + $0xf8] sm:$0xf0] }
  0xad   :  { %1829 = vmatpush.bf16.msra.mxu0 %v2368_v22  ;;  %1842 = vmatpush.bf16.msra.mxu1 %v2496_v27  ;;  %v3183_v21 = vld [vmem:[#allocation2 + $0x668] sm:$0xf]  ;;  %v3716_v22 = vld [vmem:[#allocation2 + $0x674] sm:$0xf0] }
  0xae   :  { %1855 = vmatpush.bf16.msra.mxu2 %v2624_v28  ;;  %v3311_v23 = vld [vmem:[#allocation2 + $0x768] sm:$0xf]  ;;  %v3748_v24 = vld [vmem:[#allocation2 + $0x774] sm:$0xf0]  ;;  %v3056_v28 = vor.u32 %v3684_v20, %v3055_v17  ;;  %v3184_v29 = vor.u32 %v3716_v22, %v3183_v21  ;;  %v3570_v17 = vld [vmem:[#allocation2 + $0x1ec] sm:$0xf] }
  0xaf   :  { %1868 = vmatpush.bf16.msra.mxu3 %v2752_v31  ;;  %v2911_v30 = vld [vmem:[#allocation2 + $0x448] sm:$0xf]  ;;  %v3648_v31 = vld [vmem:[#allocation2 + $0x454] sm:$0xf0]  ;;  %v3602_v20 = vld [vmem:[#allocation2 + $0x2ec] sm:$0xf] }
  0xb0   :  { %1830 = vmatmul.bf16.vlgmr.msra.gmra.mxu0 %v3906_v9  ;;  %1843 = vmatmul.bf16.vlgmr.msra.gmra.mxu1 %v3919_v25  ;;  %v3680_v36 = vld [vmem:[#allocation2 + $0x554] sm:$0xf0]  ;;  %v3167_v39 = vld [vmem:[#allocation2 + $0x648] sm:$0xf]  ;;  %v2912_v44 = vor.u32 %v3648_v31, %v2911_v30  ;;  %v2737_v21 = vld [vmem:[#allocation2 + $0x2f8] sm:$0xf0] }
  0xb1   :  { %1874 = vmatpush.bf16.msrb.mxu0 %v2992_v32  ;;  %1887 = vmatpush.bf16.msrb.mxu1 %v3120_v33  ;;  %v3039_v32 = vld [vmem:[#allocation2 + $0x548] sm:$0xf]  ;;  %v3712_v41 = vld [vmem:[#allocation2 + $0x654] sm:$0xf0] }
  0xb2   :  { %1900 = vmatpush.bf16.msrb.mxu2 %v3248_v35  ;;  %1869 = vmatmul.bf16.vlgmr.msra.gmra.mxu3 %v3911_v15  ;;  %v3312_v35 = vor.u32 %v3748_v24, %v3311_v23  ;;  %v3744_v43 = vld [vmem:[#allocation2 + $0x754] sm:$0xf0]  ;;  %v3040_v46 = vor.u32 %v3680_v36, %v3039_v32  ;;  %v3168_v47 = vor.u32 %v3712_v41, %v3167_v39  ;;  %v3279_v57 = vld [vmem:[#allocation2 + $0x728] sm:$0xf]  ;;  %v3566_v36 = vld [vmem:[#allocation2 + $0x1cc] sm:$0xf] }
  0xb3   :  { %1913 = vmatpush.bf16.msrb.mxu3 %v3376_v42  ;;  %1856 = vmatmul.bf16.vlgmr.msra.gmra.mxu2 %v3904_v8  ;;  %v3295_v42 = vld [vmem:[#allocation2 + $0x748] sm:$0xf]  ;;  %v3676_v53 = vld [vmem:[#allocation2 + $0x534] sm:$0xf0]  ;;  %v2740_v32 = vor.u32 %v3602_v20, %v2737_v21 }
  0xb4   :  { %v3296_v52 = vor.u32 %v3744_v43, %v3295_v42  ;;  %v3708_v55 = vld [vmem:[#allocation2 + $0x634] sm:$0xf0]  ;;  %v3135_v5 = vld [vmem:[#allocation2 + $0x608] sm:$0xf]  ;;  %v1638_v22 = vpop.f32.mrf.mxu1  ;;  %v2593_v42 = vld [vmem:[#allocation2 + $0x1d8] sm:$0xf0] }
  0xb5   :  { %1875 = vmatpush.bf16.msrb.mxu0 %v2976_v48  ;;  %1888 = vmatpush.bf16.msrb.mxu1 %v3104_v49  ;;  %v2895_v48 = vld [vmem:[#allocation2 + $0x428] sm:$0xf]  ;;  %v3644_v49 = vld [vmem:[#allocation2 + $0x434] sm:$0xf0]  ;;  %v3598_v43 = vld [vmem:[#allocation2 + $0x2cc] sm:$0xf] }
  0xb6   :  { %1901 = vmatpush.bf16.msrb.mxu2 %v3232_v50  ;;  %v3023_v50 = vld [vmem:[#allocation2 + $0x528] sm:$0xf]  ;;  %v3740_v58 = vld [vmem:[#allocation2 + $0x734] sm:$0xf0]  ;;  %v2896_v61 = vor.u32 %v3644_v49, %v2895_v48  ;;  %v2596_v48 = vor.u32 %v3566_v36, %v2593_v42  ;;  %v2545_v22 = vld [vmem:[#allocation2 + $0x178] sm:$0xf0] }
  0xb7   :  { %1914 = vmatpush.bf16.msrb.mxu3 %v3360_v54  ;;  %v3151_v54 = vld [vmem:[#allocation2 + $0x628] sm:$0xf]  ;;  %v3024_v1 = vor.u32 %v3676_v53, %v3023_v50  ;;  %v3672_v4 = vld [vmem:[#allocation2 + $0x514] sm:$0xf0]  ;;  %v3280_v10 = vor.u32 %v3740_v58, %v3279_v57  ;;  %v3530_v50 = vld [vmem:[#allocation2 + $0xac] sm:$0xf] }
  0xb8   :  { %v3152_v2 = vor.u32 %v3708_v55, %v3151_v54  ;;  %v3263_v12 = vld [vmem:[#allocation2 + $0x708] sm:$0xf]  ;;  %v2577_v54 = vld [vmem:[#allocation2 + $0x1b8] sm:$0xf0]  ;;  %v3594_v55 = vld [vmem:[#allocation2 + $0x2ac] sm:$0xf] }
  0xb9   :  { %1876 = vmatpush.bf16.msrb.mxu0 %v2960_v60  ;;  %1889 = vmatpush.bf16.msrb.mxu1 %v3088_v62  ;;  %v1623_v27 = vpop.f32.mrf.mxu0  ;;  %v1662_v60 = vpop.f32.mrf.mxu3  ;;  %v2879_v62 = vld [vmem:[#allocation2 + $0x408] sm:$0xf]  ;;  %v3626_v57 = vld [vmem:[#allocation2 + $0x3ac] sm:$0xf]  ;;  %v2833_v58 = vld [vmem:[#allocation2 + $0x3b8] sm:$0xf0] }
  0xba   :  { %1902 = vmatpush.bf16.msrb.mxu2 %v3216_v63  ;;  %v1624_v33 = vadd.f32 %v1623_v27, %v326_v18  ;;  %v3640_v63 = vld [vmem:[#allocation2 + $0x414] sm:$0xf0]  ;;  %v2865_v27 = vld [vmem:[#allocation2 + $0x3f8] sm:$0xf0] }
  0xbb   :  { %1915 = vmatpush.bf16.msrb.mxu3 %v3344_v3  ;;  %v3007_v3 = vld [vmem:[#allocation2 + $0x508] sm:$0xf]  ;;  %v2880_v18 = vor.u32 %v3640_v63, %v2879_v62  ;;  %v3526_v62 = vld [vmem:[#allocation2 + $0x8c] sm:$0xf]  ;;  %v2433_v63 = vld [vmem:[#allocation2 + $0x98] sm:$0xf0] }
  0xbc   :  { %v1637_v51 = vadd.f32 %v1636_v45, %v1624_v33  ;;  %v3008_v23 = vor.u32 %v3672_v4, %v3007_v3  ;;  %v3534_v33 = vld [vmem:[#allocation2 + $0xcc] sm:$0xf]  ;;  %v2689_v4 = vld [vmem:[#allocation2 + $0x298] sm:$0xf0] }
  0xbd   :  { %1877 = vmatpush.bf16.msrb.mxu0 %v2944_v11  ;;  %1890 = vmatpush.bf16.msrb.mxu1 %v3072_v13  ;;  %v3704_v11 = vld [vmem:[#allocation2 + $0x614] sm:$0xf0]  ;;  %v3630_v45 = vld [vmem:[#allocation2 + $0x3cc] sm:$0xf]  ;;  %v2657_v42 = vld [vmem:[#allocation2 + $0x258] sm:$0xf0] }
  0xbe   :  { %1903 = vmatpush.bf16.msrb.mxu2 %v3200_v14  ;;  %v1649_v56 = vpop.f32.mrf.mxu2  ;;  %v3736_v13 = vld [vmem:[#allocation2 + $0x714] sm:$0xf0]  ;;  %v3538_v14 = vld [vmem:[#allocation2 + $0xec] sm:$0xf]  ;;  %v3136_v24 = vor.u32 %v3704_v11, %v3135_v5  ;;  %v2436_v11 = vor.u32 %v3526_v62, %v2433_v63 }
  0xbf   :  { %1916 = vmatpush.bf16.msrb.mxu3 %v3328_v19  ;;  %v1650_v59 = vadd.f32 %v1649_v56, %v1637_v51  ;;  %v2609_v19 = vld [vmem:[#allocation2 + $0x1f8] sm:$0xf0]  ;;  %v3590_v3 = vld [vmem:[#allocation2 + $0x28c] sm:$0xf] }
  0xc0   :  { %v2612_v31 = vor.u32 %v3570_v17, %v2609_v19  ;;  %v2449_v51 = vld [vmem:[#allocation2 + $0xb8] sm:$0xf0]  ;;  %v3622_v5 = vld [vmem:[#allocation2 + $0x38c] sm:$0xf] }
  0xc1   :  { %1878 = vmatpush.bf16.msrb.mxu0 %v2928_v26  ;;  %1891 = vmatpush.bf16.msrb.mxu1 %v3056_v28  ;;  %v1625_v0 = vpop.f32.mrf.mxu0  ;;  %v3964_v7 = vadd.f32 %v1662_v60, %v1650_v59  ;;  %v3634_v26 = vld [vmem:[#allocation2 + $0x3ec] sm:$0xf]  ;;  %v3264_v28 = vor.u32 %v3736_v13, %v3263_v12  ;;  %v1664_v39 = vpop.f32.mrf.mxu3  ;;  %v2705_v56 = vld [vmem:[#allocation2 + $0x2b8] sm:$0xf0]  ;;  %v2452_v59 = vor.u32 %v3530_v50, %v2449_v51 }
  0xc2   :  { %1904 = vmatpush.bf16.msrb.mxu2 %v3184_v29  ;;  %v2484_v29 = vor.u32 %v3538_v14, %v2481_v16  ;;  %v2868_v41 = vor.u32 %v3634_v26, %v2865_v27  ;;  %v3558_v0 = vld [vmem:[#allocation2 + $0x18c] sm:$0xf]  ;;  %v2692_v14 = vor.u32 %v3590_v3, %v2689_v4  ;;  %v2417_v17 = vld [vmem:[#allocation2 + $0x78] sm:$0xf0] }
  0xc3   :  { %1917 = vmatpush.bf16.msrb.mxu3 %v3312_v35  ;;  %v2465_v35 = vld [vmem:[#allocation2 + $0xd8] sm:$0xf0]  ;;  %v3522_v16 = vld [vmem:[#allocation2 + $0x6c] sm:$0xf] }
  0xc4   :  { %v3618_v26 = vld [vmem:[#allocation2 + $0x36c] sm:$0xf]  ;;  %v2801_v27 = vld [vmem:[#allocation2 + $0x378] sm:$0xf0] }
  0xc5   :  { %1879 = vmatpush.bf16.msrb.mxu0 %v2912_v44  ;;  %1892 = vmatpush.bf16.msrb.mxu1 %v3040_v46  ;;  %v2721_v44 = vld [vmem:[#allocation2 + $0x2d8] sm:$0xf0]  ;;  %v3510_v63 = vld [vmem:[#allocation2 + $0xc] sm:$0xf] }
  0xc6   :  { %1905 = vmatpush.bf16.msrb.mxu2 %v3168_v47  ;;  %v1651_v30 = vpop.f32.mrf.mxu2  ;;  %v2849_v46 = vld [vmem:[#allocation2 + $0x3d8] sm:$0xf0]  ;;  %v2468_v47 = vor.u32 %v3534_v33, %v2465_v35  ;;  %v2724_v49 = vor.u32 %v3598_v43, %v2721_v44  ;;  %v3550_v35 = vld [vmem:[#allocation2 + $0x14c] sm:$0xf] }
  0xc7   :  { %1918 = vmatpush.bf16.msrb.mxu3 %v3296_v52  ;;  %v3562_v52 = vld [vmem:[#allocation2 + $0x1ac] sm:$0xf]  ;;  %v2852_v53 = vor.u32 %v3630_v45, %v2849_v46  ;;  %v2401_v33 = vld [vmem:[#allocation2 + $0x58] sm:$0xf0] }
  0xc8   :  { %v2580_v60 = vor.u32 %v3562_v52, %v2577_v54  ;;  %v2529_v39 = vld [vmem:[#allocation2 + $0x158] sm:$0xf0]  ;;  %v3614_v45 = vld [vmem:[#allocation2 + $0x34c] sm:$0xf] }
  0xc9   :  { %1880 = vmatpush.bf16.msrb.mxu0 %v2896_v61  ;;  %1893 = vmatpush.bf16.msrb.mxu1 %v3024_v1  ;;  %v2708_v61 = vor.u32 %v3594_v55, %v2705_v56  ;;  %v2836_v1 = vor.u32 %v3626_v57, %v2833_v58  ;;  %v2785_v46 = vld [vmem:[#allocation2 + $0x358] sm:$0xf0]  ;;  %v2532_v50 = vor.u32 %v3550_v35, %v2529_v39  ;;  %v3514_v52 = vld [vmem:[#allocation2 + $0x2c] sm:$0xf] }
  0xca   :  { %1906 = vmatpush.bf16.msrb.mxu2 %v3152_v2  ;;  %v2561_v2 = vld [vmem:[#allocation2 + $0x198] sm:$0xf0]  ;;  %v3546_v54 = vld [vmem:[#allocation2 + $0x12c] sm:$0xf]  ;;  %v2788_v56 = vor.u32 %v3614_v45, %v2785_v46 }
  0xcb   :  { %1919 = vmatpush.bf16.msrb.mxu3 %v3280_v10  ;;  %v2817_v10 = vld [vmem:[#allocation2 + $0x398] sm:$0xf0]  ;;  %v2564_v13 = vor.u32 %v3558_v0, %v2561_v2  ;;  %v3578_v58 = vld [vmem:[#allocation2 + $0x22c] sm:$0xf] }
  0xcc   :  { %v2820_v21 = vor.u32 %v3622_v5, %v2817_v10  ;;  %v2513_v57 = vld [vmem:[#allocation2 + $0x138] sm:$0xf0]  ;;  %v3542_v3 = vld [vmem:[#allocation2 + $0x10c] sm:$0xf] }
  0xcd   :  { %1881 = vmatpush.bf16.msrb.mxu0 %v2880_v18  ;;  %1894 = vmatpush.bf16.msrb.mxu1 %v3008_v23  ;;  %v1675_v12 = vpop.f32.mrf.mxu0  ;;  %v3554_v18 = vld [vmem:[#allocation2 + $0x16c] sm:$0xf]  ;;  %v1688_v20 = vpop.f32.mrf.mxu1  ;;  %v2369_v0 = vld [vmem:[#allocation2 + $0x18] sm:$0xf0] }
  0xce   :  { %1907 = vmatpush.bf16.msrb.mxu2 %v3136_v24  ;;  %v1676_v19 = vadd.f32 %v1675_v12, %v3964_v7  ;;  %v3586_v23 = vld [vmem:[#allocation2 + $0x26c] sm:$0xf]  ;;  %v2673_v24 = vld [vmem:[#allocation2 + $0x278] sm:$0xf0]  ;;  %v2548_v30 = vor.u32 %v3554_v18, %v2545_v22  ;;  %v2804_v7 = vor.u32 %v3618_v26, %v2801_v27 }
  0xcf   :  { %1920 = vmatpush.bf16.msrb.mxu3 %v3264_v28  ;;  %v2497_v4 = vld [vmem:[#allocation2 + $0x118] sm:$0xf0]  ;;  %v3574_v5 = vld [vmem:[#allocation2 + $0x20c] sm:$0xf] }
  0xd0   :  { %1882 = vmatmul.bf16.vlgmr.msrb.gmra.mxu0 %v3936_v37  ;;  %1895 = vmatmul.bf16.vlgmr.msrb.gmra.mxu1 %v3940_v40  ;;  %v1689_v28 = vadd.f32 %v1688_v20, %v1676_v19  ;;  %v2625_v12 = vld [vmem:[#allocation2 + $0x218] sm:$0xf0]  ;;  %v3698_v19 = vld [vmem:[#allocation2 + $0x5ec] sm:$0xf]  ;;  %v2372_v20 = vor.u32 %v3510_v63, %v2369_v0 }
  0xd1   :  { %1926 = vmatpush.bf16.msra.mxu0 %v2484_v29  ;;  %1939 = vmatpush.bf16.msra.mxu1 %v2612_v31  ;;  %v2420_v29 = vor.u32 %v3522_v16, %v2417_v17  ;;  %v2676_v31 = vor.u32 %v3586_v23, %v2673_v24  ;;  %v3666_v17 = vld [vmem:[#allocation2 + $0x4ec] sm:$0xf]  ;;  %v2993_v18 = vld [vmem:[#allocation2 + $0x4f8] sm:$0xf0]  ;;  %v2500_v24 = vor.u32 %v3542_v3, %v2497_v4 }
  0xd2   :  { %1952 = vmatpush.bf16.msra.mxu2 %v2740_v32  ;;  %1921 = vmatmul.bf16.vlgmr.msrb.gmra.mxu3 %v3938_v38  ;;  %v3518_v32 = vld [vmem:[#allocation2 + $0x4c] sm:$0xf]  ;;  %v3249_v23 = vld [vmem:[#allocation2 + $0x6f8] sm:$0xf0]  ;;  %v2628_v26 = vor.u32 %v3574_v5, %v2625_v12 }
  0xd3   :  { %1965 = vmatpush.bf16.msra.mxu3 %v2868_v41  ;;  %1908 = vmatmul.bf16.vlgmr.msrb.gmra.mxu2 %v3934_v34  ;;  %v3582_v41 = vld [vmem:[#allocation2 + $0x24c] sm:$0xf]  ;;  %v2977_v35 = vld [vmem:[#allocation2 + $0x4d8] sm:$0xf0] }
  0xd4   :  { %v2660_v51 = vor.u32 %v3582_v41, %v2657_v42  ;;  %v3730_v22 = vld [vmem:[#allocation2 + $0x6ec] sm:$0xf]  ;;  %v3105_v39 = vld [vmem:[#allocation2 + $0x5d8] sm:$0xf0] }
  0xd5   :  { %1927 = vmatpush.bf16.msra.mxu0 %v2468_v47  ;;  %1940 = vmatpush.bf16.msra.mxu1 %v2596_v48  ;;  %v1714_v44 = vpop.f32.mrf.mxu3  ;;  %v2404_v47 = vor.u32 %v3518_v32, %v2401_v33  ;;  %v1690_v55 = vpop.f32.mrf.mxu1  ;;  %v3762_v27 = vld [vmem:[#allocation2 + $0x7ec] sm:$0xf]  ;;  %v3252_v32 = vor.u32 %v3730_v22, %v3249_v23  ;;  %v3233_v42 = vld [vmem:[#allocation2 + $0x6d8] sm:$0xf0] }
  0xd6   :  { %1953 = vmatpush.bf16.msra.mxu2 %v2724_v49  ;;  %v1701_v36 = vpop.f32.mrf.mxu2  ;;  %v1677_v49 = vpop.f32.mrf.mxu0  ;;  %v3662_v33 = vld [vmem:[#allocation2 + $0x4cc] sm:$0xf]  ;;  %v3217_v55 = vld [vmem:[#allocation2 + $0x6b8] sm:$0xf0] }
  0xd7   :  { %1966 = vmatpush.bf16.msra.mxu3 %v2852_v53  ;;  %v1702_v43 = vadd.f32 %v1701_v36, %v1689_v28  ;;  %v2385_v53 = vld [vmem:[#allocation2 + $0x38] sm:$0xf0]  ;;  %v3694_v36 = vld [vmem:[#allocation2 + $0x5cc] sm:$0xf]  ;;  %v2980_v45 = vor.u32 %v3662_v33, %v2977_v35 }
  0xd8   :  { %v2388_v62 = vor.u32 %v3514_v52, %v2385_v53  ;;  %v3377_v28 = vld [vmem:[#allocation2 + $0x7f8] sm:$0xf0]  ;;  %v3726_v41 = vld [vmem:[#allocation2 + $0x6cc] sm:$0xf]  ;;  %v3108_v46 = vor.u32 %v3694_v36, %v3105_v39 }
  0xd9   :  { %1928 = vmatpush.bf16.msra.mxu0 %v2452_v59  ;;  %1941 = vmatpush.bf16.msra.mxu1 %v2580_v60  ;;  %v3971_v48 = vadd.f32 %v1714_v44, %v1702_v43  ;;  %v2641_v59 = vld [vmem:[#allocation2 + $0x238] sm:$0xf0]  ;;  %v3610_v60 = vld [vmem:[#allocation2 + $0x32c] sm:$0xf] }
  0xda   :  { %1954 = vmatpush.bf16.msra.mxu2 %v2708_v61  ;;  %v2769_v61 = vld [vmem:[#allocation2 + $0x338] sm:$0xf0]  ;;  %v2644_v2 = vor.u32 %v3578_v58, %v2641_v59  ;;  %v3758_v43 = vld [vmem:[#allocation2 + $0x7cc] sm:$0xf] }
  0xdb   :  { %1967 = vmatpush.bf16.msra.mxu3 %v2836_v1  ;;  %v2516_v1 = vor.u32 %v3546_v54, %v2513_v57  ;;  %v3361_v44 = vld [vmem:[#allocation2 + $0x7d8] sm:$0xf0]  ;;  %v3658_v49 = vld [vmem:[#allocation2 + $0x4ac] sm:$0xf] }
  0xdc   :  { %v3364_v52 = vor.u32 %v3758_v43, %v3361_v44  ;;  %v3089_v53 = vld [vmem:[#allocation2 + $0x5b8] sm:$0xf0]  ;;  %v3722_v54 = vld [vmem:[#allocation2 + $0x6ac] sm:$0xf] }
  0xdd   :  { %1929 = vmatpush.bf16.msra.mxu0 %v2436_v11  ;;  %1942 = vmatpush.bf16.msra.mxu1 %v2564_v13  ;;  %v2772_v11 = vor.u32 %v3610_v60, %v2769_v61  ;;  %v3606_v13 = vld [vmem:[#allocation2 + $0x30c] sm:$0xf]  ;;  %v1716_v16 = vpop.f32.mrf.mxu3  ;;  %v3345_v57 = vld [vmem:[#allocation2 + $0x7b8] sm:$0xf0]  ;;  %v3220_v60 = vor.u32 %v3722_v54, %v3217_v55  ;;  %v327_v54 = vperm.slane %v3961_v6, 1 }
  0xde   :  { %1955 = vmatpush.bf16.msra.mxu2 %v2692_v14  ;;  %v1703_v10 = vpop.f32.mrf.mxu2  ;;  %v2753_v14 = vld [vmem:[#allocation2 + $0x318] sm:$0xf0]  ;;  %v3654_v61 = vld [vmem:[#allocation2 + $0x48c] sm:$0xf] }
  0xdf   :  { %1968 = vmatpush.bf16.msra.mxu3 %v2820_v21  ;;  %v3121_v21 = vld [vmem:[#allocation2 + $0x5f8] sm:$0xf0]  ;;  %v3750_v3 = vld [vmem:[#allocation2 + $0x78c] sm:$0xf] }
  0xe0   :  { %v3073_v0 = vld [vmem:[#allocation2 + $0x598] sm:$0xf0]  ;;  %v3650_v10 = vld [vmem:[#allocation2 + $0x46c] sm:$0xf] }
  0xe1   :  { %1930 = vmatpush.bf16.msra.mxu0 %v2420_v29  ;;  %1943 = vmatpush.bf16.msra.mxu1 %v2548_v30  ;;  %v2756_v29 = vor.u32 %v3606_v13, %v2753_v14  ;;  %v2996_v30 = vor.u32 %v3666_v17, %v2993_v18  ;;  %v3682_v12 = vld [vmem:[#allocation2 + $0x56c] sm:$0xf]  ;;  %v3057_v16 = vld [vmem:[#allocation2 + $0x578] sm:$0xf0] }
  0xe2   :  { %1956 = vmatpush.bf16.msra.mxu2 %v2676_v31  ;;  %v3124_v31 = vor.u32 %v3698_v19, %v3121_v21  ;;  %v3714_v17 = vld [vmem:[#allocation2 + $0x66c] sm:$0xf]  ;;  %v3185_v18 = vld [vmem:[#allocation2 + $0x678] sm:$0xf0]  ;;  %v3060_v22 = vor.u32 %v3682_v12, %v3057_v16  ;;  %v3771_v16 = vld [vmem:[#allocation4 + $0x30] sm:$0xff] }
  0xe3   :  { %1969 = vmatpush.bf16.msra.mxu3 %v2804_v7  ;;  %v3380_v7 = vor.u32 %v3762_v27, %v3377_v28  ;;  %v3746_v19 = vld [vmem:[#allocation2 + $0x76c] sm:$0xf]  ;;  %v3188_v23 = vor.u32 %v3714_v17, %v3185_v18  ;;  %v3297_v36 = vld [vmem:[#allocation2 + $0x758] sm:$0xf0] }
  0xe4   :  { %v3678_v27 = vld [vmem:[#allocation2 + $0x54c] sm:$0xf]  ;;  %v2897_v44 = vld [vmem:[#allocation2 + $0x438] sm:$0xf0] }
  0xe5   :  { %1931 = vmatpush.bf16.msra.mxu0 %v2404_v47  ;;  %1944 = vmatpush.bf16.msra.mxu1 %v2532_v50  ;;  %v3236_v47 = vor.u32 %v3726_v41, %v3233_v42  ;;  %v2961_v50 = vld [vmem:[#allocation2 + $0x4b8] sm:$0xf0]  ;;  %v3742_v35 = vld [vmem:[#allocation2 + $0x74c] sm:$0xf] }
  0xe6   :  { %1957 = vmatpush.bf16.msra.mxu2 %v2660_v51  ;;  %v3690_v51 = vld [vmem:[#allocation2 + $0x5ac] sm:$0xf]  ;;  %v2964_v58 = vor.u32 %v3658_v49, %v2961_v50  ;;  %v3025_v49 = vld [vmem:[#allocation2 + $0x538] sm:$0xf0] }
  0xe7   :  { %1970 = vmatpush.bf16.msra.mxu3 %v2788_v56  ;;  %v3754_v56 = vld [vmem:[#allocation2 + $0x7ac] sm:$0xf]  ;;  %v3092_v59 = vor.u32 %v3690_v51, %v3089_v53  ;;  %v3153_v51 = vld [vmem:[#allocation2 + $0x638] sm:$0xf0] }
  0xe8   :  { %v3348_v63 = vor.u32 %v3754_v56, %v3345_v57  ;;  %v3642_v43 = vld [vmem:[#allocation2 + $0x42c] sm:$0xf]  ;;  %v3281_v53 = vld [vmem:[#allocation2 + $0x738] sm:$0xf0] }
  0xe9   :  { %1932 = vmatpush.bf16.msra.mxu0 %v2388_v62  ;;  %1945 = vmatpush.bf16.msra.mxu1 %v2516_v1  ;;  %v2945_v62 = vld [vmem:[#allocation2 + $0x498] sm:$0xf0]  ;;  %v3718_v1 = vld [vmem:[#allocation2 + $0x68c] sm:$0xf]  ;;  %v2900_v55 = vor.u32 %v3642_v43, %v2897_v44 }
  0xea   :  { %1958 = vmatpush.bf16.msra.mxu2 %v2644_v2  ;;  %v3201_v2 = vld [vmem:[#allocation2 + $0x698] sm:$0xf0]  ;;  %v3706_v50 = vld [vmem:[#allocation2 + $0x62c] sm:$0xf] }
  0xeb   :  { %1971 = vmatpush.bf16.msra.mxu3 %v2772_v11  ;;  %v3204_v5 = vor.u32 %v3718_v1, %v3201_v2  ;;  %v2929_v11 = vld [vmem:[#allocation2 + $0x478] sm:$0xf0]  ;;  %v3156_v57 = vor.u32 %v3706_v50, %v3153_v51  ;;  %v3734_v2 = vld [vmem:[#allocation2 + $0x70c] sm:$0xf] }
  0xec   :  { %v2932_v21 = vor.u32 %v3650_v10, %v2929_v11  ;;  %v3772_v11 = vld [vmem:[#allocation4 + $0x38] sm:$0xff] }
  0xed   :  { %1933 = vmatpush.bf16.msra.mxu0 %v2372_v20  ;;  %1946 = vmatpush.bf16.msra.mxu1 %v2500_v24  ;;  %v3977_v4 = vpop.f32.mrf.mxu0  ;;  %v3979_v13 = vpop.f32.mrf.mxu1  ;;  %v3313_v20 = vld [vmem:[#allocation2 + $0x778] sm:$0xf0]  ;;  %v3646_v24 = vld [vmem:[#allocation2 + $0x44c] sm:$0xf] }
  0xee   :  { %1959 = vmatpush.bf16.msra.mxu2 %v2628_v26  ;;  %v2913_v26 = vld [vmem:[#allocation2 + $0x458] sm:$0xf0] }
  0xef   :  { %1972 = vmatpush.bf16.msra.mxu3 %v2756_v29  ;;  %v3316_v29 = vor.u32 %v3746_v19, %v3313_v20  ;;  %v3780_v12 = vld [vmem:[#allocation4 + $0x78] sm:$0xff]  ;;  %v3778_v20 = vld [vmem:[#allocation4 + $0x68] sm:$0xff] }
  0xf0   :  { %1934 = vmatmul.bf16.vlgmr.msra.gmra.mxu0 %v3906_v9  ;;  %1947 = vmatmul.bf16.vlgmr.msra.gmra.mxu1 %v3919_v25  ;;  %v3329_v9 = vld [vmem:[#allocation2 + $0x798] sm:$0xf0] }
  0xf1   :  { %1978 = vmatpush.bf16.msrb.mxu0 %v2996_v30  ;;  %1991 = vmatpush.bf16.msrb.mxu1 %v3124_v31  ;;  %v3332_v14 = vor.u32 %v3750_v3, %v3329_v9  ;;  %v3041_v30 = vld [vmem:[#allocation2 + $0x558] sm:$0xf0]  ;;  %v3710_v31 = vld [vmem:[#allocation2 + $0x64c] sm:$0xf]  ;;  %v1728_v9 = vadd.f32 %v3977_v4, %v327_v54  ;;  %v3779_v4 = vld [vmem:[#allocation4 + $0x70] sm:$0xff] }
  0xf2   :  { %2004 = vmatpush.bf16.msrb.mxu2 %v3252_v32  ;;  %1973 = vmatmul.bf16.vlgmr.msra.gmra.mxu3 %v3911_v15  ;;  %v2948_v15 = vor.u32 %v3654_v61, %v2945_v62  ;;  %v3169_v32 = vld [vmem:[#allocation2 + $0x658] sm:$0xf0]  ;;  %v3044_v41 = vor.u32 %v3678_v27, %v3041_v30  ;;  %v3767_v30 = vld [vmem:[#allocation4 + $0x10] sm:$0xff] }
  0xf3   :  { %2017 = vmatpush.bf16.msrb.mxu3 %v3380_v7  ;;  %1960 = vmatmul.bf16.vlgmr.msra.gmra.mxu2 %v3904_v8  ;;  %v3686_v8 = vld [vmem:[#allocation2 + $0x58c] sm:$0xf]  ;;  %v2916_v7 = vor.u32 %v3646_v24, %v2913_v26  ;;  %v3172_v42 = vor.u32 %v3710_v31, %v3169_v32  ;;  %v3265_v3 = vld [vmem:[#allocation2 + $0x718] sm:$0xf0]  ;;  %v3787_v26 = vld [vmem:[#allocation4 + $0xb0] sm:$0xff] }
  0xf4   :  { %v3076_v25 = vor.u32 %v3686_v8, %v3073_v0  ;;  %v3009_v8 = vld [vmem:[#allocation2 + $0x518] sm:$0xf0]  ;;  %v3268_v10 = vor.u32 %v3734_v2, %v3265_v3  ;;  %v3783_v54 = vld [vmem:[#allocation4 + $0x90] sm:$0xff] }
  0xf5   :  { %1979 = vmatpush.bf16.msrb.mxu0 %v2980_v45  ;;  %1992 = vmatpush.bf16.msrb.mxu1 %v3108_v46  ;;  %v3983_v33 = vpop.f32.mrf.mxu3  ;;  %v1729_v39 = vpop.f32.mrf.mxu0  ;;  %v3674_v45 = vld [vmem:[#allocation2 + $0x52c] sm:$0xf]  ;;  %v3137_v0 = vld [vmem:[#allocation2 + $0x618] sm:$0xf0] }
  0xf6   :  { %2005 = vmatpush.bf16.msrb.mxu2 %v3236_v47  ;;  %v3981_v28 = vpop.f32.mrf.mxu2  ;;  %v1742_v46 = vpop.f32.mrf.mxu1  ;;  %v3300_v47 = vor.u32 %v3742_v35, %v3297_v36  ;;  %v3028_v56 = vor.u32 %v3674_v45, %v3025_v49  ;;  %v3788_v17 = vld [vmem:[#allocation4 + $0xb8] sm:$0xff]  ;;  %v3775_v35 = vld [vmem:[#allocation4 + $0x50] sm:$0xff]  ;;  %v3766_v39 = vld [vmem:[#allocation4 + $0x8] sm:$0xff] }
  0xf7   :  { %2018 = vmatpush.bf16.msrb.mxu3 %v3364_v52  ;;  %v3738_v52 = vld [vmem:[#allocation2 + $0x72c] sm:$0xf]  ;;  %v3765_v46 = vld [vmem:[#allocation4] sm:$0xff] }
  0xf8   :  { %v3284_v62 = vor.u32 %v3738_v52, %v3281_v53  ;;  %v3773_v49 = vld [vmem:[#allocation4 + $0x40] sm:$0xff] }
  0xf9   :  { %1980 = vmatpush.bf16.msrb.mxu0 %v2964_v58  ;;  %1993 = vmatpush.bf16.msrb.mxu1 %v3092_v59  ;;  %v3638_v58 = vld [vmem:[#allocation2 + $0x40c] sm:$0xf]  ;;  %v2881_v59 = vld [vmem:[#allocation2 + $0x418] sm:$0xf0] }
  0xfa   :  { %2006 = vmatpush.bf16.msrb.mxu2 %v3220_v60  ;;  %v3670_v60 = vld [vmem:[#allocation2 + $0x50c] sm:$0xf] }
  0xfb   :  { %2019 = vmatpush.bf16.msrb.mxu3 %v3348_v63  ;;  %v3702_v63 = vld [vmem:[#allocation2 + $0x60c] sm:$0xf] }
  0xfd   :  { %1981 = vmatpush.bf16.msrb.mxu0 %v2948_v15  ;;  %1994 = vmatpush.bf16.msrb.mxu1 %v3076_v25  ;;  %v1768_v1 = vpop.f32.mrf.mxu3  ;;  %v2884_v15 = vor.u32 %v3638_v58, %v2881_v59  ;;  %v3012_v25 = vor.u32 %v3670_v60, %v3009_v8  ;;  %v3781_v60 = vld [vmem:[#allocation4 + $0x80] sm:$0xff] }
  0xfe   :  { %2007 = vmatpush.bf16.msrb.mxu2 %v3204_v5  ;;  %v1755_v61 = vpop.f32.mrf.mxu2  ;;  %v3140_v5 = vor.u32 %v3702_v63, %v3137_v0 }
  0xff   :  { %2020 = vmatpush.bf16.msrb.mxu3 %v3332_v14  ;;  %v1741_v14 = vadd.f32 %v3979_v13, %v1728_v9  ;;  %v3770_v13 = vld [vmem:[#allocation4 + $0x28] sm:$0xff] }
 0x101   :  { %1982 = vmatpush.bf16.msrb.mxu0 %v2932_v21  ;;  %1995 = vmatpush.bf16.msrb.mxu1 %v3060_v22  ;;  %v1754_v18 = vadd.f32 %v3981_v28, %v1741_v14  ;;  %v3769_v21 = vld [vmem:[#allocation4 + $0x20] sm:$0xff] }
 0x102   :  { %2008 = vmatpush.bf16.msrb.mxu2 %v3188_v23 }
 0x103   :  { %2021 = vmatpush.bf16.msrb.mxu3 %v3316_v29  ;;  %v1767_v19 = vadd.f32 %v3983_v33, %v1754_v18  ;;  %v3786_v29 = vld [vmem:[#allocation4 + $0xa8] sm:$0xff]  ;;  %v3785_v33 = vld [vmem:[#allocation4 + $0xa0] sm:$0xff] }
 0x105   :  { %1983 = vmatpush.bf16.msrb.mxu0 %v2916_v7  ;;  %1996 = vmatpush.bf16.msrb.mxu1 %v3044_v41  ;;  %v3784_v41 = vld [vmem:[#allocation4 + $0x98] sm:$0xff] }
 0x106   :  { %2009 = vmatpush.bf16.msrb.mxu2 %v3172_v42  ;;  %v3774_v42 = vld [vmem:[#allocation4 + $0x48] sm:$0xff] }
 0x107   :  { %2022 = vmatpush.bf16.msrb.mxu3 %v3300_v47  ;;  %v2030_v47 = vmax.f32 %v3971_v48, 0.0  ;;  %v328_v48 = vperm.slane %v3961_v6, 2 }
 0x109   :  { %1984 = vmatpush.bf16.msrb.mxu0 %v2900_v55  ;;  %1997 = vmatpush.bf16.msrb.mxu1 %v3028_v56  ;;  %v2034_v51 = vpack.c.bf16 %v2030_v47, %v2030_v47 }
 0x10a   :  { %2010 = vmatpush.bf16.msrb.mxu2 %v3156_v57  ;;  %v3782_v57 = vld [vmem:[#allocation4 + $0x88] sm:$0xff] }
 0x10b   :  { %2023 = vmatpush.bf16.msrb.mxu3 %v3284_v62 }
 0x10d   :  { %1985 = vmatpush.bf16.msrb.mxu0 %v2884_v15  ;;  %1998 = vmatpush.bf16.msrb.mxu1 %v3012_v25  ;;  %v1779_v22 = vpop.f32.mrf.mxu0  ;;  %v1792_v24 = vpop.f32.mrf.mxu1 }
 0x10e   :  { %2011 = vmatpush.bf16.msrb.mxu2 %v3140_v5  ;;  %v1780_v23 = vadd.f32 %v1779_v22, %v1767_v19  ;;  %v3792_v22 = vld [vmem:[#allocation4 + $0xd8] sm:$0xff] }
 0x10f   :  { %2024 = vmatpush.bf16.msrb.mxu3 %v3268_v10 }
 0x110   :  { %1986 = vmatmul.bf16.vlgmr.msrb.gmra.mxu0 %v3936_v37  ;;  %1999 = vmatmul.bf16.vlgmr.msrb.gmra.mxu1 %v3940_v40  ;;  %v3777_v37 = vld [vmem:[#allocation4 + $0x60] sm:$0xff]  ;;  %v1793_v40 = vadd.f32 %v1792_v24, %v1780_v23 }
 0x111   :  { %2298 = vmatpush.bf16.msra.mxu0 %v3772_v11  ;;  %2311 = vmatpush.bf16.msra.mxu1 %v3780_v12  ;;  %v3796_v11 = vld [vmem:[#allocation4 + $0xf8] sm:$0xff] }
 0x112   :  { %2012 = vmatmul.bf16.vlgmr.msrb.gmra.mxu2 %v3934_v34  ;;  %2025 = vmatmul.bf16.vlgmr.msrb.gmra.mxu3 %v3938_v38  ;;  %v3768_v34 = vld [vmem:[#allocation4 + $0x18] sm:$0xff] }
 0x113   :  { %2324 = vmatpush.bf16.msra.mxu2 %v3788_v17  ;;  %v3776_v38 = vld [vmem:[#allocation4 + $0x58] sm:$0xff]  ;;  %2337 = vmatpush.bf16.msra.mxu3 %v3796_v11 }
 0x115   :  { %2299 = vmatpush.bf16.msra.mxu0 %v3771_v16  ;;  %2312 = vmatpush.bf16.msra.mxu1 %v3779_v4  ;;  %v1818_v28 = vpop.f32.mrf.mxu3  ;;  %v1781_v32 = vpop.f32.mrf.mxu0  ;;  %v3795_v16 = vld [vmem:[#allocation4 + $0xf0] sm:$0xff] }
 0x116   :  { %v1805_v27 = vpop.f32.mrf.mxu2  ;;  %v1794_v36 = vpop.f32.mrf.mxu1 }
 0x117   :  { %2325 = vmatpush.bf16.msra.mxu2 %v3787_v26  ;;  %v1806_v31 = vadd.f32 %v1805_v27, %v1793_v40  ;;  %2338 = vmatpush.bf16.msra.mxu3 %v3795_v16  ;;  %v3790_v26 = vld [vmem:[#allocation4 + $0xc8] sm:$0xff]  ;;  %v3789_v27 = vld [vmem:[#allocation4 + $0xc0] sm:$0xff] }
 0x119   :  { %2300 = vmatpush.bf16.msra.mxu0 %v3770_v13  ;;  %2313 = vmatpush.bf16.msra.mxu1 %v3778_v20  ;;  %v1819_v7 = vadd.f32 %v1818_v28, %v1806_v31  ;;  %v3794_v13 = vld [vmem:[#allocation4 + $0xe8] sm:$0xff] }
 0x11b   :  { %2326 = vmatpush.bf16.msra.mxu2 %v3786_v29  ;;  %v2031_v45 = vmax.f32 %v1819_v7, 0.0  ;;  %2339 = vmatpush.bf16.msra.mxu3 %v3794_v13  ;;  %v329_v29 = vperm.slane %v3961_v6, 3 }
 0x11d   :  { %2301 = vmatpush.bf16.msra.mxu0 %v3769_v21  ;;  %2314 = vmatpush.bf16.msra.mxu1 %v3777_v37  ;;  %v1820_v44 = vpop.f32.mrf.mxu3  ;;  %v2035_v50 = vpack.c.bf16 %v2031_v45, %v2031_v45  ;;  %v3793_v21 = vld [vmem:[#allocation4 + $0xe0] sm:$0xff]  ;;  %v3791_v37 = vld [vmem:[#allocation4 + $0xd0] sm:$0xff] }
 0x11e   :  { %v1807_v43 = vpop.f32.mrf.mxu2 }
 0x11f   :  { %2327 = vmatpush.bf16.msra.mxu2 %v3785_v33  ;;  %2340 = vmatpush.bf16.msra.mxu3 %v3793_v21 }
 0x121   :  { %2302 = vmatpush.bf16.msra.mxu0 %v3768_v34  ;;  %2315 = vmatpush.bf16.msra.mxu1 %v3776_v38 }
 0x123   :  { %2328 = vmatpush.bf16.msra.mxu2 %v3784_v41  ;;  %2341 = vmatpush.bf16.msra.mxu3 %v3792_v22 }
 0x125   :  { %2303 = vmatpush.bf16.msra.mxu0 %v3767_v30  ;;  %2316 = vmatpush.bf16.msra.mxu1 %v3775_v35 }
 0x127   :  { %2329 = vmatpush.bf16.msra.mxu2 %v3783_v54  ;;  %2342 = vmatpush.bf16.msra.mxu3 %v3791_v37 }
 0x129   :  { %2304 = vmatpush.bf16.msra.mxu0 %v3766_v39  ;;  %2317 = vmatpush.bf16.msra.mxu1 %v3774_v42 }
 0x12b   :  { %2330 = vmatpush.bf16.msra.mxu2 %v3782_v57  ;;  %2343 = vmatpush.bf16.msra.mxu3 %v3790_v26 }
 0x12d   :  { %2305 = vmatpush.bf16.msra.mxu0 %v3765_v46  ;;  %2318 = vmatpush.bf16.msra.mxu1 %v3773_v49  ;;  %v1831_v52 = vpop.f32.mrf.mxu0  ;;  %v1844_v53 = vpop.f32.mrf.mxu1 }
 0x12e   :  { %v1832_v8 = vadd.f32 %v1831_v52, %v328_v48 }
 0x12f   :  { %2331 = vmatpush.bf16.msra.mxu2 %v3781_v60  ;;  %2344 = vmatpush.bf16.msra.mxu3 %v3789_v27 }
 0x130   :  { %2306 = vmatmul.bf16.vlgmr.msra.gmra.mxu0 %v2034_v51  ;;  %2319 = vmatmul.bf16.vlgmr.msra.gmra.mxu1 %v2035_v50  ;;  %v1845_v63 = vadd.f32 %v1844_v53, %v1832_v8  ;;  %v3803_v53 = vld [vmem:[%s4007_s4] ss:$0 sm:$0xff] }
 0x135   :  { %v1870_v56 = vpop.f32.mrf.mxu3  ;;  %v1833_v58 = vpop.f32.mrf.mxu0 }
 0x136   :  { %v1857_v55 = vpop.f32.mrf.mxu2  ;;  %v1846_v59 = vpop.f32.mrf.mxu1 }
 0x137   :  { %v1858_v0 = vadd.f32 %v1857_v55, %v1845_v63 }
 0x139   :  { %v1871_v1 = vadd.f32 %v1870_v56, %v1858_v0 }
 0x13d   :  { %v1872_v62 = vpop.f32.mrf.mxu3 }
 0x13e   :  { %v1859_v61 = vpop.f32.mrf.mxu2 }
 0x14d   :  { %v1883_v2 = vpop.f32.mrf.mxu0  ;;  %v1896_v9 = vpop.f32.mrf.mxu1 }
 0x14e   :  { %v1884_v3 = vadd.f32 %v1883_v2, %v1871_v1 }
 0x150   :  { %v1897_v15 = vadd.f32 %v1896_v9, %v1884_v3 }
 0x155   :  { %v1922_v10 = vpop.f32.mrf.mxu3  ;;  %v1885_v14 = vpop.f32.mrf.mxu0 }
 0x156   :  { %v1909_v25 = vpop.f32.mrf.mxu2  ;;  %v1898_v17 = vpop.f32.mrf.mxu1 }
 0x157   :  { %v1910_v5 = vadd.f32 %v1909_v25, %v1897_v15 }
 0x159   :  { %v1923_v12 = vadd.f32 %v1922_v10, %v1910_v5 }
 0x15b   :  { %v2032_v4 = vmax.f32 %v1923_v12, 0.0 }
 0x15d   :  { %v2036_v18 = vpack.c.bf16 %v2032_v4, %v2032_v4  ;;  %v1924_v20 = vpop.f32.mrf.mxu3 }
 0x15e   :  { %v1911_v19 = vpop.f32.mrf.mxu2 }
 0x15f   :  { %2332 = vmatmul.bf16.vlgmr.msra.gmra.mxu2 %v2036_v18 }
 0x16d   :  { %v1935_v23 = vpop.f32.mrf.mxu0  ;;  %v1948_v24 = vpop.f32.mrf.mxu1 }
 0x16e   :  { %v1936_v32 = vadd.f32 %v1935_v23, %v329_v29 }
 0x170   :  { %v1949_v33 = vadd.f32 %v1948_v24, %v1936_v32 }
 0x175   :  { %v1974_v40 = vpop.f32.mrf.mxu3  ;;  %v1937_v38 = vpop.f32.mrf.mxu0 }
 0x176   :  { %v1961_v34 = vpop.f32.mrf.mxu2  ;;  %v1950_v28 = vpop.f32.mrf.mxu1 }
 0x177   :  { %v1962_v35 = vadd.f32 %v1961_v34, %v1949_v33 }
 0x179   :  { %v1975_v36 = vadd.f32 %v1974_v40, %v1962_v35 }
 0x17d   :  { %v1976_v31 = vpop.f32.mrf.mxu3 }
 0x17e   :  { %v1963_v30 = vpop.f32.mrf.mxu2 }
 0x18d   :  { %v1987_v7 = vpop.f32.mrf.mxu0  ;;  %v2000_v39 = vpop.f32.mrf.mxu1 }
 0x18e   :  { %v1988_v41 = vadd.f32 %v1987_v7, %v1975_v36 }
 0x190   :  { %v2001_v42 = vadd.f32 %v2000_v39, %v1988_v41 }
 0x195   :  { %v2013_v43 = vpop.f32.mrf.mxu2  ;;  %v2026_v45 = vpop.f32.mrf.mxu3 }
 0x196   :  { %v2014_v44 = vadd.f32 %v2013_v43, %v2001_v42  ;;  %v1989_v46 = vpop.f32.mrf.mxu0  ;;  %v2002_v47 = vpop.f32.mrf.mxu1 }
 0x198   :  { %v2027_v49 = vadd.f32 %v2026_v45, %v2014_v44 }
 0x19a   :  { %v2033_v50 = vmax.f32 %v2027_v49, 0.0 }
 0x19c   :  { %v2037_v51 = vpack.c.bf16 %v2033_v50, %v2033_v50 }
 0x19d   :  { %v2015_v52 = vpop.f32.mrf.mxu2  ;;  %v2028_v6 = vpop.f32.mrf.mxu3 }
 0x19e   :  { %2345 = vmatmul.bf16.vlgmr.msra.gmra.mxu3 %v2037_v51 }
 0x1ad   :  { %v2307_v54 = vpop.f32.mrf.mxu0  ;;  %v2320_v56 = vpop.f32.mrf.mxu1 }
 0x1ae   :  { %v2308_v55 = vadd.f32 %v3803_v53, %v2307_v54 }
 0x1b0   :  { %v2321_v57 = vadd.f32 %v2320_v56, %v2308_v55 }
 0x1b5   :  { %v2309_v58 = vpop.f32.mrf.mxu0  ;;  %v2322_v59 = vpop.f32.mrf.mxu1 }
 0x1e2   :  { %v2333_v60 = vpop.f32.mrf.mxu2 }
 0x1e3   :  { %v2334_v61 = vadd.f32 %v2333_v60, %v2321_v57 }
 0x1ea   :  { %v2335_v48 = vpop.f32.mrf.mxu2 }
 0x221   :  { %v2346_v62 = vpop.f32.mrf.mxu3 }
 0x222   :  { %v2347_v8 = vadd.f32 %v2346_v62, %v2334_v61 }
 0x224   :  { %2350 = vst [vmem:[%s4008_s5] sm:$0xff] %v2347_v8 }
 0x229   :  { %v2348_v63 = vpop.f32.mrf.mxu3 }
 0x22a   :  { %2355 = vsyncpa [#allocation3], 1 }
 0x22b   :  { %2356 = vsyncpa [#allocation5], 1 }

</bundles_post_ra>
